<compile_context>
chip_gen: v7x
topology: tpu7x:2x2x1
jax: 0.10.0
libtpu: 0.0.40
codegen_flags: <defaults>
</compile_context>

<pallas_src>
import functools
import math

import jax
import jax.numpy as jnp
from jax import lax
from jax.experimental import pallas as pl
from jax.experimental.pallas import tpu as pltpu


# ------------------------------- kernel ------------------------------------ #
def _fused_mha_kernel(q_in_ref, k_in_ref, v_in_ref, r_in_ref,
                      wq_ref, wk_ref, wv_ref, wr_ref, wo_ref,
                      bq_ref, bk_ref, bv_ref, br_ref, bo_ref,
                      o_ref,
                      kall_ref, vall_ref,
                      *, h, d_k, lk, lr, compute_dtype):
    f32 = jnp.float32
    d_model = h * d_k

    # ---- once per batch: project K, V and fused [RK | RV] into VMEM scratch
    # (persists across the sequential "arbitrary" q-tile axis).
    @pl.when(pl.program_id(1) == 0)
    def _project_context():
        k = jnp.dot(k_in_ref[0], wk_ref[...], preferred_element_type=f32) + bk_ref[...]
        v = jnp.dot(v_in_ref[0], wv_ref[...], preferred_element_type=f32) + bv_ref[...]
        r = jnp.dot(r_in_ref[0], wr_ref[...], preferred_element_type=f32) + br_ref[...]
        kall_ref[:lk, :] = k.astype(compute_dtype)            # rows [0, Lk)   = K
        vall_ref[:lk, :] = v.astype(compute_dtype)            # rows [0, Lk)   = V
        kall_ref[lk:, :] = r[:, :d_model].astype(compute_dtype)   # rows [Lk, ·) = RK
        vall_ref[lk:, :] = r[:, d_model:].astype(compute_dtype)   # rows [Lk, ·) = RV

    # ---- per q-tile: the only q-dependent projection ----
    q = (jnp.dot(q_in_ref[0], wq_ref[...], preferred_element_type=f32)
         + bq_ref[...]).astype(compute_dtype)                 # (tq, d_model)

    k_all = kall_ref[...]                                     # (Lk+Lr, d_model)
    v_all = vall_ref[...]
    wo = wo_ref[...]

    scale = 1.0 / math.sqrt(d_k)
    dn = (((1,), (1,)), ((), ()))      # contract last dims (no explicit transpose)

    tq = q.shape[0]
    acc = jnp.zeros((tq, d_model), f32)

    # Heads unrolled with static slices (guaranteed lowering).  For very large
    # h, staging per-head tiles in (h, L, d_k) scratch + lax.fori_loop would
    # bound vreg live ranges; unnecessary at moderate h.
    for hi in range(h):
        sl = slice(hi * d_k, (hi + 1) * d_k)
        qh, kh, vh = q[:, sl], k_all[:, sl], v_all[:, sl]

        # single score matmul against the concatenated [K ; RK] context
        s_all = lax.dot_general(qh, kh, dn, preferred_element_type=f32) * scale
        # TODO(synk): mask / weak_rela_mask (module default None) not applied here.
        s_vis, s_rel = s_all[:, :lk], s_all[:, lk:]

        # two independent softmaxes (f32, exact normalisation)
        e_vis = jnp.exp(s_vis - jnp.max(s_vis, axis=-1, keepdims=True))
        e_rel = jnp.exp(s_rel - jnp.max(s_rel, axis=-1, keepdims=True))
        p_vis = e_vis / jnp.sum(e_vis, axis=-1, keepdims=True)
        p_rel = e_rel / jnp.sum(e_rel, axis=-1, keepdims=True)
        p_all = jnp.concatenate([p_vis, p_rel], axis=-1).astype(compute_dtype)

        # single P @ [V ; RV] matmul, then fold the head straight into Wo:
        # concat(heads) @ Wo == sum_h head_h @ Wo[h*d_k:(h+1)*d_k, :]
        head = jnp.dot(p_all, vh, preferred_element_type=f32)          # (tq, d_k)
        acc = acc + jnp.dot(head.astype(compute_dtype), wo[sl, :],
                            preferred_element_type=f32)

    o_ref[0] = (acc + bo_ref[...]).astype(o_ref.dtype)


# ------------------------------- wrapper ------------------------------------ #
def mha_cross_relation_decoder(params, query, key, value, weak_rela, h, *,
                               tq=None, compute_dtype=jnp.bfloat16):
    """Mirrors MultiHeadedAttention_Crosss_Relation_Decoder.forward (mask=None)."""
    (wq, bq), (wk, bk), (wv, bv), (wrk, brk), (wrv, brv), (wo, bo) = params
    B, Lq, d_model = query.shape
    Lk = key.shape[1]
    Lv = value.shape[1]
    Lr = weak_rela.shape[1]
    assert d_model % h == 0
    d_k = d_model // h
    assert Lv == Lk, "attention requires len(value) == len(key)"

    # ---- q-tile size: big tiles amortize per-step overhead; whole sequence
    # when it already fits comfortably.
    if tq is None:
        tq = Lq
        if Lq > 512:
            for cand in (512, 384, 256, 128, 64):
                if Lq % cand == 0:
                    tq = cand
                    break
    if tq != Lq:
        assert tq % 8 == 0 and Lq % tq == 0, "tq must be a multiple of 8 dividing Lq"
    n_q = Lq // tq

    # ---- fuse the two relation projections (same input tensor) ----
    w_r = jnp.concatenate([wrk, wrv], axis=1)          # (d_model, 2*d_model)
    b_r = jnp.concatenate([brk, brv], axis=1)          # (1, 2*d_model)

    # feed the MXU in bf16 (halves activation/weight DMA bytes + VMEM);
    # biases stay f32 since they are added to f32 accumulators.
    cd = compute_dtype
    q_in, k_in, v_in, r_in = (x.astype(cd) for x in (query, key, value, weak_rela))
    wq_c, wk_c, wv_c, wr_c, wo_c = (w.astype(cd) for w in (wq, wk, wv, w_r, wo))
    bq_c, bk_c, bv_c, br_c, bo_c = (b.astype(jnp.float32) for b in (bq, bk, bv, b_r, bo))

    # weights/biases: constant index_map → single-buffered (saves 6*d_model^2
    # bytes of VMEM vs. default double buffering; matters on v7x's 64 MiB).
    bufone = pl.Buffered(1)

    def wspec(shape):
        return pl.BlockSpec(shape, lambda b, i: (0, 0), pipeline_mode=bufone)

    in_specs = [
        pl.BlockSpec((1, tq, d_model), lambda b, i: (b, i, 0)),   # query tile
        pl.BlockSpec((1, Lk, d_model), lambda b, i: (b, 0, 0)),   # key   (per-batch)
        pl.BlockSpec((1, Lk, d_model), lambda b, i: (b, 0, 0)),   # value (per-batch)
        pl.BlockSpec((1, Lr, d_model), lambda b, i: (b, 0, 0)),   # weak_rela
        wspec((d_model, d_model)),        # wq
        wspec((d_model, d_model)),        # wk
        wspec((d_model, d_model)),        # wv
        wspec((d_model, 2 * d_model)),    # w_r (fused rk|rv)
        wspec((d_model, d_model)),        # wo
        wspec((1, d_model)),              # bq
        wspec((1, d_model)),              # bk
        wspec((1, d_model)),              # bv
        wspec((1, 2 * d_model)),          # b_r
        wspec((1, d_model)),              # bo
    ]
    out_specs = pl.BlockSpec((1, tq, d_model), lambda b, i: (b, i, 0))

    scratch_shapes = [
        pltpu.VMEM((Lk + Lr, d_model), cd),   # cached [K ; RK] projection
        pltpu.VMEM((Lk + Lr, d_model), cd),   # cached [V ; RV] projection
    ]

    # ---- VMEM budget: raise the 16/32 MiB scoped default, cap at v7x's 64 MiB
    isz = jnp.dtype(cd).itemsize
    vmem_est = (
        2 * tq * d_model * isz                                   # q tile (2 bufs)
        + 2 * 2 * Lk * d_model * isz                             # key + value blocks
        + 2 * Lr * d_model * isz                                 # weak_rela block
        + (4 * d_model * d_model + 2 * d_model * d_model) * isz  # weights (1 buf)
        + 2 * tq * d_model * 4                                   # out tile (f32, 2 bufs)
        + 2 * (Lk + Lr) * d_model * isz                          # scratch
        + 4 * tq * (Lk + Lr) * 4                                 # score/prob temporaries
    )
    vmem_limit = int(min(64 * 1024 * 1024, max(32 * 1024 * 1024, 2 * vmem_est)))

    # advisory cost estimate (projections counted once per batch now)
    proj_flops = 2 * d_model * d_model * B * (Lq + 2 * Lk + 2 * Lr)
    attn_flops = 4 * B * Lq * (Lk + Lr) * d_model
    out_flops = 2 * B * Lq * d_model * d_model
    transcendentals = B * h * Lq * (Lk + Lr)
    bytes_accessed = (isz * (query.size + key.size + value.size + weak_rela.size
                             + 6 * d_model * d_model)
                      + 4 * (6 * d_model + B * Lq * d_model))

    kernel = functools.partial(_fused_mha_kernel, h=h, d_k=d_k, lk=Lk, lr=Lr,
                               compute_dtype=cd)

    return pl.pallas_call(
        kernel,
        out_shape=jax.ShapeDtypeStruct((B, Lq, d_model), query.dtype),
        grid=(B, n_q),
        in_specs=in_specs,
        out_specs=out_specs,
        scratch_shapes=scratch_shapes,
        compiler_params=pltpu.CompilerParams(
            # batch axis shards across TensorCores (v7x megacore); q-tile axis
            # must stay sequential so the cached K/V/relation projections in
            # VMEM scratch remain valid across q-tiles of the same batch.
            dimension_semantics=("parallel", "arbitrary"),
            vmem_limit_bytes=vmem_limit),
        cost_estimate=pl.CostEstimate(
            flops=int(proj_flops + attn_flops + out_flops),
            transcendentals=int(transcendentals),
            bytes_accessed=int(bytes_accessed)),
    )(q_in, k_in, v_in, r_in,
      wq_c, wk_c, wv_c, wr_c, wo_c,
      bq_c, bk_c, bv_c, br_c, bo_c)


# ------------------------------ params init --------------------------------- #
def init_params(key, d_model):
    """6 Linear(d_model, d_model) layers, PyTorch-style uniform init (x @ w + b)."""
    params = []
    bound = 1.0 / math.sqrt(d_model)
    for _ in range(6):
        kw, kb, key = jax.random.split(key, 3)
        w = jax.random.uniform(kw, (d_model, d_model), jnp.float32, -bound, bound)
        b = jax.random.uniform(kb, (1, d_model), jnp.float32, -bound, bound)
        params.append((w, b))
    return params


# ------------------------------ reference ----------------------------------- #
def _reference(params, query, key, value, weak_rela, h):
    B, Lq, d_model = query.shape
    d_k = d_model // h

    def project(x, w, b):
        L = x.shape[1]
        y = x.reshape(B * L, d_model) @ w + b
        return jnp.transpose(y.reshape(B, L, h, d_k), (0, 2, 1, 3))

    q = project(query, *params[0])
    k = project(key, *params[1])
    v = project(value, *params[2])
    rk = project(weak_rela, *params[3])
    rv = project(weak_rela, *params[4])

    scale = 1.0 / math.sqrt(d_k)
    qk = jnp.einsum("bhqd,bhkd->bhqk", q, k) * scale
    qr = jnp.einsum("bhqd,bhkd->bhqk", q, rk) * scale
    x = (jnp.einsum("bhqk,bhkd->bhqd", jax.nn.softmax(qk, -1), v)
         + jnp.einsum("bhqk,bhkd->bhqd", jax.nn.softmax(qr, -1), rv))
    x = jnp.transpose(x, (0, 2, 1, 3)).reshape(B * Lq, d_model)
    w, b = params[5]
    return (x @ w + b).reshape(B, Lq, d_model)


if __name__ == "__main__":
    # Lq > Lk and an explicit tq < Lq so the per-batch projection caching
    # (pl.when on the "arbitrary" q-tile axis) is actually exercised.
    B, Lq, Lkv, d_model, h = 2, 16, 8, 32, 4

    root = jax.random.PRNGKey(0)
    kp, kq, kk, kv, kr = jax.random.split(root, 5)
    params = init_params(kp, d_model)

    query = jax.random.normal(kq, (B, Lq, d_model), jnp.float32)
    key = jax.random.normal(kk, (B, Lkv, d_model), jnp.float32)
    value = jax.random.normal(kv, (B, Lkv, d_model), jnp.float32)
    weak_rela = jax.random.normal(kr, (B, Lkv, d_model), jnp.float32)

    out = mha_cross_relation_decoder(params, query, key, value, weak_rela, h, tq=8)
    out = jax.block_until_ready(out)

    ref = _reference(params, query, key, value, weak_rela, h)
    assert out.shape == (B, Lq, d_model)
    # bf16 MXU operands (activations / weights / probs) vs. an f32 reference →
    # modest tolerance; softmax normalisation itself is an exact f32 divide.
    max_err = float(jnp.max(jnp.abs(out - ref)))
    assert jnp.allclose(out, ref, rtol=3e-2, atol=3e-2), max_err

    print("KERNEL_OK")
</pallas_src>

<mosaic_0001>
module attributes {stable_mosaic.version = 11 : i64} {
  func.func @_fused_mha_kernel(%arg0: i32, %arg1: i32, %arg2: memref<1x8x32xbf16, #tpu.memory_space<vmem>>, %arg3: memref<1x8x32xbf16, #tpu.memory_space<vmem>>, %arg4: memref<1x8x32xbf16, #tpu.memory_space<vmem>>, %arg5: memref<1x8x32xbf16, #tpu.memory_space<vmem>>, %arg6: memref<32x32xbf16, #tpu.memory_space<vmem>>, %arg7: memref<32x32xbf16, #tpu.memory_space<vmem>>, %arg8: memref<32x32xbf16, #tpu.memory_space<vmem>>, %arg9: memref<32x64xbf16, #tpu.memory_space<vmem>>, %arg10: memref<32x32xbf16, #tpu.memory_space<vmem>>, %arg11: memref<1x32xf32, #tpu.memory_space<vmem>>, %arg12: memref<1x32xf32, #tpu.memory_space<vmem>>, %arg13: memref<1x32xf32, #tpu.memory_space<vmem>>, %arg14: memref<1x64xf32, #tpu.memory_space<vmem>>, %arg15: memref<1x32xf32, #tpu.memory_space<vmem>>, %arg16: memref<1x8x32xf32, #tpu.memory_space<vmem>>, %arg17: memref<16x32xbf16, #tpu.memory_space<vmem>>, %arg18: memref<16x32xbf16, #tpu.memory_space<vmem>>) attributes {dimension_semantics = [#tpu.dimension_semantics<parallel>, #tpu.dimension_semantics<arbitrary>], iteration_bounds = array<i64: 2, 2>, scalar_prefetch = 0 : i64, scratch_operands = 2 : i64, tpu.core_type = #tpu.core_type<tc>, window_params = [{transform_indices = @transform_0, window_bounds = array<i64: 1, 8, 32>}, {transform_indices = @transform_1, window_bounds = array<i64: 1, 8, 32>}, {transform_indices = @transform_2, window_bounds = array<i64: 1, 8, 32>}, {transform_indices = @transform_3, window_bounds = array<i64: 1, 8, 32>}, {pipeline_mode = #tpu.pipeline_mode<synchronous>, transform_indices = @transform_4, window_bounds = array<i64: 32, 32>}, {pipeline_mode = #tpu.pipeline_mode<synchronous>, transform_indices = @transform_5, window_bounds = array<i64: 32, 32>}, {pipeline_mode = #tpu.pipeline_mode<synchronous>, transform_indices = @transform_6, window_bounds = array<i64: 32, 32>}, {pipeline_mode = #tpu.pipeline_mode<synchronous>, transform_indices = @transform_7, window_bounds = array<i64: 32, 64>}, {pipeline_mode = #tpu.pipeline_mode<synchronous>, transform_indices = @transform_8, window_bounds = array<i64: 32, 32>}, {pipeline_mode = #tpu.pipeline_mode<synchronous>, transform_indices = @transform_9, window_bounds = array<i64: 1, 32>}, {pipeline_mode = #tpu.pipeline_mode<synchronous>, transform_indices = @transform_10, window_bounds = array<i64: 1, 32>}, {pipeline_mode = #tpu.pipeline_mode<synchronous>, transform_indices = @transform_11, window_bounds = array<i64: 1, 32>}, {pipeline_mode = #tpu.pipeline_mode<synchronous>, transform_indices = @transform_12, window_bounds = array<i64: 1, 64>}, {pipeline_mode = #tpu.pipeline_mode<synchronous>, transform_indices = @transform_13, window_bounds = array<i64: 1, 32>}, {transform_indices = @transform_14, window_bounds = array<i64: 1, 8, 32>}]} {
    %c0_i32 = arith.constant 0 : i32
    %0 = arith.cmpi eq, %arg1, %c0_i32 : i32
    %1 = arith.extui %0 : i1 to i32
    %c0_i32_0 = arith.constant 0 : i32
    %2 = arith.cmpi ne, %1, %c0_i32_0 : i32
    scf.if %2 {
      %c0_51 = arith.constant 0 : index
      %c0_52 = arith.constant 0 : index
      %c0_53 = arith.constant 0 : index
      %153 = vector.load %arg3[%c0_51, %c0_52, %c0_53] : memref<1x8x32xbf16, #tpu.memory_space<vmem>>, vector<1x8x32xbf16>
      %154 = vector.shape_cast %153 : vector<1x8x32xbf16> to vector<8x32xbf16>
      %c0_54 = arith.constant 0 : index
      %c0_55 = arith.constant 0 : index
      %155 = vector.load %arg7[%c0_54, %c0_55] : memref<32x32xbf16, #tpu.memory_space<vmem>>, vector<32x32xbf16>
      %cst_56 = arith.constant dense<0.000000e+00> : vector<8x32xf32>
      %156 = tpu.matmul %154, %155, %cst_56 {dimension_numbers = #tpu.dot_dimension_numbers<[1], [0], [0], [1], [0, 0, 1, 1], [], []>} : vector<8x32xbf16>, vector<32x32xbf16>, vector<8x32xf32> -> vector<8x32xf32>
      %c0_57 = arith.constant 0 : index
      %c0_58 = arith.constant 0 : index
      %157 = vector.load %arg12[%c0_57, %c0_58] : memref<1x32xf32, #tpu.memory_space<vmem>>, vector<1x32xf32>
      %158 = vector.broadcast %157 : vector<1x32xf32> to vector<8x32xf32>
      %159 = arith.addf %156, %158 : vector<8x32xf32>
      %c0_59 = arith.constant 0 : index
      %c0_60 = arith.constant 0 : index
      %c0_61 = arith.constant 0 : index
      %160 = vector.load %arg4[%c0_59, %c0_60, %c0_61] : memref<1x8x32xbf16, #tpu.memory_space<vmem>>, vector<1x8x32xbf16>
      %161 = vector.shape_cast %160 : vector<1x8x32xbf16> to vector<8x32xbf16>
      %c0_62 = arith.constant 0 : index
      %c0_63 = arith.constant 0 : index
      %162 = vector.load %arg8[%c0_62, %c0_63] : memref<32x32xbf16, #tpu.memory_space<vmem>>, vector<32x32xbf16>
      %cst_64 = arith.constant dense<0.000000e+00> : vector<8x32xf32>
      %163 = tpu.matmul %161, %162, %cst_64 {dimension_numbers = #tpu.dot_dimension_numbers<[1], [0], [0], [1], [0, 0, 1, 1], [], []>} : vector<8x32xbf16>, vector<32x32xbf16>, vector<8x32xf32> -> vector<8x32xf32>
      %c0_65 = arith.constant 0 : index
      %c0_66 = arith.constant 0 : index
      %164 = vector.load %arg13[%c0_65, %c0_66] : memref<1x32xf32, #tpu.memory_space<vmem>>, vector<1x32xf32>
      %165 = vector.broadcast %164 : vector<1x32xf32> to vector<8x32xf32>
      %166 = arith.addf %163, %165 : vector<8x32xf32>
      %c0_67 = arith.constant 0 : index
      %c0_68 = arith.constant 0 : index
      %c0_69 = arith.constant 0 : index
      %167 = vector.load %arg5[%c0_67, %c0_68, %c0_69] : memref<1x8x32xbf16, #tpu.memory_space<vmem>>, vector<1x8x32xbf16>
      %168 = vector.shape_cast %167 : vector<1x8x32xbf16> to vector<8x32xbf16>
      %c0_70 = arith.constant 0 : index
      %c0_71 = arith.constant 0 : index
      %169 = vector.load %arg9[%c0_70, %c0_71] : memref<32x64xbf16, #tpu.memory_space<vmem>>, vector<32x64xbf16>
      %cst_72 = arith.constant dense<0.000000e+00> : vector<8x64xf32>
      %170 = tpu.matmul %168, %169, %cst_72 {dimension_numbers = #tpu.dot_dimension_numbers<[1], [0], [0], [1], [0, 0, 1, 1], [], []>} : vector<8x32xbf16>, vector<32x64xbf16>, vector<8x64xf32> -> vector<8x64xf32>
      %c0_73 = arith.constant 0 : index
      %c0_74 = arith.constant 0 : index
      %171 = vector.load %arg14[%c0_73, %c0_74] : memref<1x64xf32, #tpu.memory_space<vmem>>, vector<1x64xf32>
      %172 = vector.broadcast %171 : vector<1x64xf32> to vector<8x64xf32>
      %173 = arith.addf %170, %172 : vector<8x64xf32>
      %174 = arith.truncf %159 : vector<8x32xf32> to vector<8x32xbf16>
      %c0_75 = arith.constant 0 : index
      %c0_76 = arith.constant 0 : index
      %175 = vector.load %arg17[%c0_75, %c0_76] : memref<16x32xbf16, #tpu.memory_space<vmem>>, vector<8x32xbf16>
      tpu.vector_store %arg17[%c0_75, %c0_76], %174 {strides = array<i32>} : memref<16x32xbf16, #tpu.memory_space<vmem>>, vector<8x32xbf16>,
      %176 = arith.truncf %166 : vector<8x32xf32> to vector<8x32xbf16>
      %c0_77 = arith.constant 0 : index
      %c0_78 = arith.constant 0 : index
      %177 = vector.load %arg18[%c0_77, %c0_78] : memref<16x32xbf16, #tpu.memory_space<vmem>>, vector<8x32xbf16>
      tpu.vector_store %arg18[%c0_77, %c0_78], %176 {strides = array<i32>} : memref<16x32xbf16, #tpu.memory_space<vmem>>, vector<8x32xbf16>,
      %178 = vector.extract_strided_slice %173 {offsets = [0, 0], sizes = [8, 32], strides = [1, 1]} : vector<8x64xf32> to vector<8x32xf32>
      %179 = arith.truncf %178 : vector<8x32xf32> to vector<8x32xbf16>
      %c8 = arith.constant 8 : index
      %c0_79 = arith.constant 0 : index
      %180 = vector.load %arg17[%c8, %c0_79] : memref<16x32xbf16, #tpu.memory_space<vmem>>, vector<8x32xbf16>
      tpu.vector_store %arg17[%c8, %c0_79], %179 {strides = array<i32>} : memref<16x32xbf16, #tpu.memory_space<vmem>>, vector<8x32xbf16>,
      %181 = vector.extract_strided_slice %173 {offsets = [0, 32], sizes = [8, 32], strides = [1, 1]} : vector<8x64xf32> to vector<8x32xf32>
      %182 = arith.truncf %181 : vector<8x32xf32> to vector<8x32xbf16>
      %c8_80 = arith.constant 8 : index
      %c0_81 = arith.constant 0 : index
      %183 = vector.load %arg18[%c8_80, %c0_81] : memref<16x32xbf16, #tpu.memory_space<vmem>>, vector<8x32xbf16>
      tpu.vector_store %arg18[%c8_80, %c0_81], %182 {strides = array<i32>} : memref<16x32xbf16, #tpu.memory_space<vmem>>, vector<8x32xbf16>,
    } else {
    }
    %c0 = arith.constant 0 : index
    %c0_1 = arith.constant 0 : index
    %c0_2 = arith.constant 0 : index
    %3 = vector.load %arg2[%c0, %c0_1, %c0_2] : memref<1x8x32xbf16, #tpu.memory_space<vmem>>, vector<1x8x32xbf16>
    %4 = vector.shape_cast %3 : vector<1x8x32xbf16> to vector<8x32xbf16>
    %c0_3 = arith.constant 0 : index
    %c0_4 = arith.constant 0 : index
    %5 = vector.load %arg6[%c0_3, %c0_4] : memref<32x32xbf16, #tpu.memory_space<vmem>>, vector<32x32xbf16>
    %cst = arith.constant dense<0.000000e+00> : vector<8x32xf32>
    %6 = tpu.matmul %4, %5, %cst {dimension_numbers = #tpu.dot_dimension_numbers<[1], [0], [0], [1], [0, 0, 1, 1], [], []>} : vector<8x32xbf16>, vector<32x32xbf16>, vector<8x32xf32> -> vector<8x32xf32>
    %c0_5 = arith.constant 0 : index
    %c0_6 = arith.constant 0 : index
    %7 = vector.load %arg11[%c0_5, %c0_6] : memref<1x32xf32, #tpu.memory_space<vmem>>, vector<1x32xf32>
    %8 = vector.broadcast %7 : vector<1x32xf32> to vector<8x32xf32>
    %9 = arith.addf %6, %8 : vector<8x32xf32>
    %10 = arith.truncf %9 : vector<8x32xf32> to vector<8x32xbf16>
    %c0_7 = arith.constant 0 : index
    %c0_8 = arith.constant 0 : index
    %11 = vector.load %arg17[%c0_7, %c0_8] : memref<16x32xbf16, #tpu.memory_space<vmem>>, vector<16x32xbf16>
    %c0_9 = arith.constant 0 : index
    %c0_10 = arith.constant 0 : index
    %12 = vector.load %arg18[%c0_9, %c0_10] : memref<16x32xbf16, #tpu.memory_space<vmem>>, vector<16x32xbf16>
    %c0_11 = arith.constant 0 : index
    %c0_12 = arith.constant 0 : index
    %13 = vector.load %arg10[%c0_11, %c0_12] : memref<32x32xbf16, #tpu.memory_space<vmem>>, vector<32x32xbf16>
    %cst_13 = arith.constant 0.000000e+00 : f32
    %14 = vector.broadcast %cst_13 : f32 to vector<8x32xf32>
    %15 = vector.extract_strided_slice %10 {offsets = [0, 0], sizes = [8, 8], strides = [1, 1]} : vector<8x32xbf16> to vector<8x8xbf16>
    %16 = vector.extract_strided_slice %11 {offsets = [0, 0], sizes = [16, 8], strides = [1, 1]} : vector<16x32xbf16> to vector<16x8xbf16>
    %17 = vector.extract_strided_slice %12 {offsets = [0, 0], sizes = [16, 8], strides = [1, 1]} : vector<16x32xbf16> to vector<16x8xbf16>
    %cst_14 = arith.constant dense<0.000000e+00> : vector<8x16xf32>
    %18 = tpu.matmul %15, %16, %cst_14 {dimension_numbers = #tpu.dot_dimension_numbers<[1], [1], [0], [0], [0, 0, 1, 0], [], []>} : vector<8x8xbf16>, vector<16x8xbf16>, vector<8x16xf32> -> vector<8x16xf32>
    %cst_15 = arith.constant 0.353553385 : f32
    %19 = vector.broadcast %cst_15 : f32 to vector<8x16xf32>
    %20 = arith.mulf %18, %19 : vector<8x16xf32>
    %21 = vector.extract_strided_slice %20 {offsets = [0, 0], sizes = [8, 8], strides = [1, 1]} : vector<8x16xf32> to vector<8x8xf32>
    %22 = vector.extract_strided_slice %20 {offsets = [0, 8], sizes = [8, 8], strides = [1, 1]} : vector<8x16xf32> to vector<8x8xf32>
    %cst_16 = arith.constant dense<0xFF800000> : vector<8xf32>
    %23 = vector.multi_reduction <maximumf>, %21, %cst_16 [1] : vector<8x8xf32> to vector<8xf32>
    %24 = vector.shape_cast %23 : vector<8xf32> to vector<8x1xf32>
    %25 = vector.broadcast %24 : vector<8x1xf32> to vector<8x8xf32>
    %26 = arith.subf %21, %25 : vector<8x8xf32>
    %27 = math.exp %26 : vector<8x8xf32>
    %cst_17 = arith.constant dense<0xFF800000> : vector<8xf32>
    %28 = vector.multi_reduction <maximumf>, %22, %cst_17 [1] : vector<8x8xf32> to vector<8xf32>
    %29 = vector.shape_cast %28 : vector<8xf32> to vector<8x1xf32>
    %30 = vector.broadcast %29 : vector<8x1xf32> to vector<8x8xf32>
    %31 = arith.subf %22, %30 : vector<8x8xf32>
    %32 = math.exp %31 : vector<8x8xf32>
    %cst_18 = arith.constant dense<0.000000e+00> : vector<8xf32>
    %33 = vector.multi_reduction <add>, %27, %cst_18 [1] : vector<8x8xf32> to vector<8xf32>
    %34 = vector.shape_cast %33 : vector<8xf32> to vector<8x1xf32>
    %35 = vector.broadcast %34 : vector<8x1xf32> to vector<8x8xf32>
    %36 = arith.divf %27, %35 : vector<8x8xf32>
    %cst_19 = arith.constant dense<0.000000e+00> : vector<8xf32>
    %37 = vector.multi_reduction <add>, %32, %cst_19 [1] : vector<8x8xf32> to vector<8xf32>
    %38 = vector.shape_cast %37 : vector<8xf32> to vector<8x1xf32>
    %39 = vector.broadcast %38 : vector<8x1xf32> to vector<8x8xf32>
    %40 = arith.divf %32, %39 : vector<8x8xf32>
    %41 = tpu.concatenate %36, %40 in 1 : vector<8x8xf32>, vector<8x8xf32> -> vector<8x16xf32>
    %42 = arith.truncf %41 : vector<8x16xf32> to vector<8x16xbf16>
    %cst_20 = arith.constant dense<0.000000e+00> : vector<8x8xf32>
    %43 = tpu.matmul %42, %17, %cst_20 {dimension_numbers = #tpu.dot_dimension_numbers<[1], [0], [0], [1], [0, 0, 1, 1], [], []>} : vector<8x16xbf16>, vector<16x8xbf16>, vector<8x8xf32> -> vector<8x8xf32>
    %44 = arith.truncf %43 : vector<8x8xf32> to vector<8x8xbf16>
    %45 = vector.extract_strided_slice %13 {offsets = [0, 0], sizes = [8, 32], strides = [1, 1]} : vector<32x32xbf16> to vector<8x32xbf16>
    %cst_21 = arith.constant dense<0.000000e+00> : vector<8x32xf32>
    %46 = tpu.matmul %44, %45, %cst_21 {dimension_numbers = #tpu.dot_dimension_numbers<[1], [0], [0], [1], [0, 0, 1, 1], [], []>} : vector<8x8xbf16>, vector<8x32xbf16>, vector<8x32xf32> -> vector<8x32xf32>
    %47 = arith.addf %14, %46 : vector<8x32xf32>
    %48 = vector.extract_strided_slice %10 {offsets = [0, 8], sizes = [8, 8], strides = [1, 1]} : vector<8x32xbf16> to vector<8x8xbf16>
    %49 = vector.extract_strided_slice %11 {offsets = [0, 8], sizes = [16, 8], strides = [1, 1]} : vector<16x32xbf16> to vector<16x8xbf16>
    %50 = vector.extract_strided_slice %12 {offsets = [0, 8], sizes = [16, 8], strides = [1, 1]} : vector<16x32xbf16> to vector<16x8xbf16>
    %cst_22 = arith.constant dense<0.000000e+00> : vector<8x16xf32>
    %51 = tpu.matmul %48, %49, %cst_22 {dimension_numbers = #tpu.dot_dimension_numbers<[1], [1], [0], [0], [0, 0, 1, 0], [], []>} : vector<8x8xbf16>, vector<16x8xbf16>, vector<8x16xf32> -> vector<8x16xf32>
    %cst_23 = arith.constant 0.353553385 : f32
    %52 = vector.broadcast %cst_23 : f32 to vector<8x16xf32>
    %53 = arith.mulf %51, %52 : vector<8x16xf32>
    %54 = vector.extract_strided_slice %53 {offsets = [0, 0], sizes = [8, 8], strides = [1, 1]} : vector<8x16xf32> to vector<8x8xf32>
    %55 = vector.extract_strided_slice %53 {offsets = [0, 8], sizes = [8, 8], strides = [1, 1]} : vector<8x16xf32> to vector<8x8xf32>
    %cst_24 = arith.constant dense<0xFF800000> : vector<8xf32>
    %56 = vector.multi_reduction <maximumf>, %54, %cst_24 [1] : vector<8x8xf32> to vector<8xf32>
    %57 = vector.shape_cast %56 : vector<8xf32> to vector<8x1xf32>
    %58 = vector.broadcast %57 : vector<8x1xf32> to vector<8x8xf32>
    %59 = arith.subf %54, %58 : vector<8x8xf32>
    %60 = math.exp %59 : vector<8x8xf32>
    %cst_25 = arith.constant dense<0xFF800000> : vector<8xf32>
    %61 = vector.multi_reduction <maximumf>, %55, %cst_25 [1] : vector<8x8xf32> to vector<8xf32>
    %62 = vector.shape_cast %61 : vector<8xf32> to vector<8x1xf32>
    %63 = vector.broadcast %62 : vector<8x1xf32> to vector<8x8xf32>
    %64 = arith.subf %55, %63 : vector<8x8xf32>
    %65 = math.exp %64 : vector<8x8xf32>
    %cst_26 = arith.constant dense<0.000000e+00> : vector<8xf32>
    %66 = vector.multi_reduction <add>, %60, %cst_26 [1] : vector<8x8xf32> to vector<8xf32>
    %67 = vector.shape_cast %66 : vector<8xf32> to vector<8x1xf32>
    %68 = vector.broadcast %67 : vector<8x1xf32> to vector<8x8xf32>
    %69 = arith.divf %60, %68 : vector<8x8xf32>
    %cst_27 = arith.constant dense<0.000000e+00> : vector<8xf32>
    %70 = vector.multi_reduction <add>, %65, %cst_27 [1] : vector<8x8xf32> to vector<8xf32>
    %71 = vector.shape_cast %70 : vector<8xf32> to vector<8x1xf32>
    %72 = vector.broadcast %71 : vector<8x1xf32> to vector<8x8xf32>
    %73 = arith.divf %65, %72 : vector<8x8xf32>
    %74 = tpu.concatenate %69, %73 in 1 : vector<8x8xf32>, vector<8x8xf32> -> vector<8x16xf32>
    %75 = arith.truncf %74 : vector<8x16xf32> to vector<8x16xbf16>
    %cst_28 = arith.constant dense<0.000000e+00> : vector<8x8xf32>
    %76 = tpu.matmul %75, %50, %cst_28 {dimension_numbers = #tpu.dot_dimension_numbers<[1], [0], [0], [1], [0, 0, 1, 1], [], []>} : vector<8x16xbf16>, vector<16x8xbf16>, vector<8x8xf32> -> vector<8x8xf32>
    %77 = arith.truncf %76 : vector<8x8xf32> to vector<8x8xbf16>
    %78 = vector.extract_strided_slice %13 {offsets = [8, 0], sizes = [8, 32], strides = [1, 1]} : vector<32x32xbf16> to vector<8x32xbf16>
    %cst_29 = arith.constant dense<0.000000e+00> : vector<8x32xf32>
    %79 = tpu.matmul %77, %78, %cst_29 {dimension_numbers = #tpu.dot_dimension_numbers<[1], [0], [0], [1], [0, 0, 1, 1], [], []>} : vector<8x8xbf16>, vector<8x32xbf16>, vector<8x32xf32> -> vector<8x32xf32>
    %80 = arith.addf %47, %79 : vector<8x32xf32>
    %81 = vector.extract_strided_slice %10 {offsets = [0, 16], sizes = [8, 8], strides = [1, 1]} : vector<8x32xbf16> to vector<8x8xbf16>
    %82 = vector.extract_strided_slice %11 {offsets = [0, 16], sizes = [16, 8], strides = [1, 1]} : vector<16x32xbf16> to vector<16x8xbf16>
    %83 = vector.extract_strided_slice %12 {offsets = [0, 16], sizes = [16, 8], strides = [1, 1]} : vector<16x32xbf16> to vector<16x8xbf16>
    %cst_30 = arith.constant dense<0.000000e+00> : vector<8x16xf32>
    %84 = tpu.matmul %81, %82, %cst_30 {dimension_numbers = #tpu.dot_dimension_numbers<[1], [1], [0], [0], [0, 0, 1, 0], [], []>} : vector<8x8xbf16>, vector<16x8xbf16>, vector<8x16xf32> -> vector<8x16xf32>
    %cst_31 = arith.constant 0.353553385 : f32
    %85 = vector.broadcast %cst_31 : f32 to vector<8x16xf32>
    %86 = arith.mulf %84, %85 : vector<8x16xf32>
    %87 = vector.extract_strided_slice %86 {offsets = [0, 0], sizes = [8, 8], strides = [1, 1]} : vector<8x16xf32> to vector<8x8xf32>
    %88 = vector.extract_strided_slice %86 {offsets = [0, 8], sizes = [8, 8], strides = [1, 1]} : vector<8x16xf32> to vector<8x8xf32>
    %cst_32 = arith.constant dense<0xFF800000> : vector<8xf32>
    %89 = vector.multi_reduction <maximumf>, %87, %cst_32 [1] : vector<8x8xf32> to vector<8xf32>
    %90 = vector.shape_cast %89 : vector<8xf32> to vector<8x1xf32>
    %91 = vector.broadcast %90 : vector<8x1xf32> to vector<8x8xf32>
    %92 = arith.subf %87, %91 : vector<8x8xf32>
    %93 = math.exp %92 : vector<8x8xf32>
    %cst_33 = arith.constant dense<0xFF800000> : vector<8xf32>
    %94 = vector.multi_reduction <maximumf>, %88, %cst_33 [1] : vector<8x8xf32> to vector<8xf32>
    %95 = vector.shape_cast %94 : vector<8xf32> to vector<8x1xf32>
    %96 = vector.broadcast %95 : vector<8x1xf32> to vector<8x8xf32>
    %97 = arith.subf %88, %96 : vector<8x8xf32>
    %98 = math.exp %97 : vector<8x8xf32>
    %cst_34 = arith.constant dense<0.000000e+00> : vector<8xf32>
    %99 = vector.multi_reduction <add>, %93, %cst_34 [1] : vector<8x8xf32> to vector<8xf32>
    %100 = vector.shape_cast %99 : vector<8xf32> to vector<8x1xf32>
    %101 = vector.broadcast %100 : vector<8x1xf32> to vector<8x8xf32>
    %102 = arith.divf %93, %101 : vector<8x8xf32>
    %cst_35 = arith.constant dense<0.000000e+00> : vector<8xf32>
    %103 = vector.multi_reduction <add>, %98, %cst_35 [1] : vector<8x8xf32> to vector<8xf32>
    %104 = vector.shape_cast %103 : vector<8xf32> to vector<8x1xf32>
    %105 = vector.broadcast %104 : vector<8x1xf32> to vector<8x8xf32>
    %106 = arith.divf %98, %105 : vector<8x8xf32>
    %107 = tpu.concatenate %102, %106 in 1 : vector<8x8xf32>, vector<8x8xf32> -> vector<8x16xf32>
    %108 = arith.truncf %107 : vector<8x16xf32> to vector<8x16xbf16>
    %cst_36 = arith.constant dense<0.000000e+00> : vector<8x8xf32>
    %109 = tpu.matmul %108, %83, %cst_36 {dimension_numbers = #tpu.dot_dimension_numbers<[1], [0], [0], [1], [0, 0, 1, 1], [], []>} : vector<8x16xbf16>, vector<16x8xbf16>, vector<8x8xf32> -> vector<8x8xf32>
    %110 = arith.truncf %109 : vector<8x8xf32> to vector<8x8xbf16>
    %111 = vector.extract_strided_slice %13 {offsets = [16, 0], sizes = [8, 32], strides = [1, 1]} : vector<32x32xbf16> to vector<8x32xbf16>
    %cst_37 = arith.constant dense<0.000000e+00> : vector<8x32xf32>
    %112 = tpu.matmul %110, %111, %cst_37 {dimension_numbers = #tpu.dot_dimension_numbers<[1], [0], [0], [1], [0, 0, 1, 1], [], []>} : vector<8x8xbf16>, vector<8x32xbf16>, vector<8x32xf32> -> vector<8x32xf32>
    %113 = arith.addf %80, %112 : vector<8x32xf32>
    %114 = vector.extract_strided_slice %10 {offsets = [0, 24], sizes = [8, 8], strides = [1, 1]} : vector<8x32xbf16> to vector<8x8xbf16>
    %115 = vector.extract_strided_slice %11 {offsets = [0, 24], sizes = [16, 8], strides = [1, 1]} : vector<16x32xbf16> to vector<16x8xbf16>
    %116 = vector.extract_strided_slice %12 {offsets = [0, 24], sizes = [16, 8], strides = [1, 1]} : vector<16x32xbf16> to vector<16x8xbf16>
    %cst_38 = arith.constant dense<0.000000e+00> : vector<8x16xf32>
    %117 = tpu.matmul %114, %115, %cst_38 {dimension_numbers = #tpu.dot_dimension_numbers<[1], [1], [0], [0], [0, 0, 1, 0], [], []>} : vector<8x8xbf16>, vector<16x8xbf16>, vector<8x16xf32> -> vector<8x16xf32>
    %cst_39 = arith.constant 0.353553385 : f32
    %118 = vector.broadcast %cst_39 : f32 to vector<8x16xf32>
    %119 = arith.mulf %117, %118 : vector<8x16xf32>
    %120 = vector.extract_strided_slice %119 {offsets = [0, 0], sizes = [8, 8], strides = [1, 1]} : vector<8x16xf32> to vector<8x8xf32>
    %121 = vector.extract_strided_slice %119 {offsets = [0, 8], sizes = [8, 8], strides = [1, 1]} : vector<8x16xf32> to vector<8x8xf32>
    %cst_40 = arith.constant dense<0xFF800000> : vector<8xf32>
    %122 = vector.multi_reduction <maximumf>, %120, %cst_40 [1] : vector<8x8xf32> to vector<8xf32>
    %123 = vector.shape_cast %122 : vector<8xf32> to vector<8x1xf32>
    %124 = vector.broadcast %123 : vector<8x1xf32> to vector<8x8xf32>
    %125 = arith.subf %120, %124 : vector<8x8xf32>
    %126 = math.exp %125 : vector<8x8xf32>
    %cst_41 = arith.constant dense<0xFF800000> : vector<8xf32>
    %127 = vector.multi_reduction <maximumf>, %121, %cst_41 [1] : vector<8x8xf32> to vector<8xf32>
    %128 = vector.shape_cast %127 : vector<8xf32> to vector<8x1xf32>
    %129 = vector.broadcast %128 : vector<8x1xf32> to vector<8x8xf32>
    %130 = arith.subf %121, %129 : vector<8x8xf32>
    %131 = math.exp %130 : vector<8x8xf32>
    %cst_42 = arith.constant dense<0.000000e+00> : vector<8xf32>
    %132 = vector.multi_reduction <add>, %126, %cst_42 [1] : vector<8x8xf32> to vector<8xf32>
    %133 = vector.shape_cast %132 : vector<8xf32> to vector<8x1xf32>
    %134 = vector.broadcast %133 : vector<8x1xf32> to vector<8x8xf32>
    %135 = arith.divf %126, %134 : vector<8x8xf32>
    %cst_43 = arith.constant dense<0.000000e+00> : vector<8xf32>
    %136 = vector.multi_reduction <add>, %131, %cst_43 [1] : vector<8x8xf32> to vector<8xf32>
    %137 = vector.shape_cast %136 : vector<8xf32> to vector<8x1xf32>
    %138 = vector.broadcast %137 : vector<8x1xf32> to vector<8x8xf32>
    %139 = arith.divf %131, %138 : vector<8x8xf32>
    %140 = tpu.concatenate %135, %139 in 1 : vector<8x8xf32>, vector<8x8xf32> -> vector<8x16xf32>
    %141 = arith.truncf %140 : vector<8x16xf32> to vector<8x16xbf16>
    %cst_44 = arith.constant dense<0.000000e+00> : vector<8x8xf32>
    %142 = tpu.matmul %141, %116, %cst_44 {dimension_numbers = #tpu.dot_dimension_numbers<[1], [0], [0], [1], [0, 0, 1, 1], [], []>} : vector<8x16xbf16>, vector<16x8xbf16>, vector<8x8xf32> -> vector<8x8xf32>
    %143 = arith.truncf %142 : vector<8x8xf32> to vector<8x8xbf16>
    %144 = vector.extract_strided_slice %13 {offsets = [24, 0], sizes = [8, 32], strides = [1, 1]} : vector<32x32xbf16> to vector<8x32xbf16>
    %cst_45 = arith.constant dense<0.000000e+00> : vector<8x32xf32>
    %145 = tpu.matmul %143, %144, %cst_45 {dimension_numbers = #tpu.dot_dimension_numbers<[1], [0], [0], [1], [0, 0, 1, 1], [], []>} : vector<8x8xbf16>, vector<8x32xbf16>, vector<8x32xf32> -> vector<8x32xf32>
    %146 = arith.addf %113, %145 : vector<8x32xf32>
    %c0_46 = arith.constant 0 : index
    %c0_47 = arith.constant 0 : index
    %147 = vector.load %arg15[%c0_46, %c0_47] : memref<1x32xf32, #tpu.memory_space<vmem>>, vector<1x32xf32>
    %148 = vector.broadcast %147 : vector<1x32xf32> to vector<8x32xf32>
    %149 = arith.addf %146, %148 : vector<8x32xf32>
    %c0_48 = arith.constant 0 : index
    %c0_49 = arith.constant 0 : index
    %c0_50 = arith.constant 0 : index
    %150 = vector.load %arg16[%c0_48, %c0_49, %c0_50] : memref<1x8x32xf32, #tpu.memory_space<vmem>>, vector<1x8x32xf32>
    %151 = vector.shape_cast %150 : vector<1x8x32xf32> to vector<8x32xf32>
    %152 = vector.shape_cast %149 : vector<8x32xf32> to vector<1x8x32xf32>
    tpu.vector_store %arg16[%c0_48, %c0_49, %c0_50], %152 {strides = array<i32>} : memref<1x8x32xf32, #tpu.memory_space<vmem>>, vector<1x8x32xf32>,
    return
  }
  func.func @transform_0(%arg0: i32, %arg1: i32) -> (i32, i32, i32) {
    %c0_i32 = arith.constant 0 : i32
    %c0_i32_0 = arith.constant 0 : i32
    return %arg0, %arg1, %c0_i32 : i32, i32, i32
  }
  func.func @transform_1(%arg0: i32, %arg1: i32) -> (i32, i32, i32) {
    %c0_i32 = arith.constant 0 : i32
    %c0_i32_0 = arith.constant 0 : i32
    %c0_i32_1 = arith.constant 0 : i32
    return %arg0, %c0_i32, %c0_i32_0 : i32, i32, i32
  }
  func.func @transform_2(%arg0: i32, %arg1: i32) -> (i32, i32, i32) {
    %c0_i32 = arith.constant 0 : i32
    %c0_i32_0 = arith.constant 0 : i32
    %c0_i32_1 = arith.constant 0 : i32
    return %arg0, %c0_i32, %c0_i32_0 : i32, i32, i32
  }
  func.func @transform_3(%arg0: i32, %arg1: i32) -> (i32, i32, i32) {
    %c0_i32 = arith.constant 0 : i32
    %c0_i32_0 = arith.constant 0 : i32
    %c0_i32_1 = arith.constant 0 : i32
    return %arg0, %c0_i32, %c0_i32_0 : i32, i32, i32
  }
  func.func @transform_4(%arg0: i32, %arg1: i32) -> (i32, i32) {
    %c0_i32 = arith.constant 0 : i32
    %c0_i32_0 = arith.constant 0 : i32
    %c0_i32_1 = arith.constant 0 : i32
    return %c0_i32, %c0_i32_0 : i32, i32
  }
  func.func @transform_5(%arg0: i32, %arg1: i32) -> (i32, i32) {
    %c0_i32 = arith.constant 0 : i32
    %c0_i32_0 = arith.constant 0 : i32
    %c0_i32_1 = arith.constant 0 : i32
    return %c0_i32, %c0_i32_0 : i32, i32
  }
  func.func @transform_6(%arg0: i32, %arg1: i32) -> (i32, i32) {
    %c0_i32 = arith.constant 0 : i32
    %c0_i32_0 = arith.constant 0 : i32
    %c0_i32_1 = arith.constant 0 : i32
    return %c0_i32, %c0_i32_0 : i32, i32
  }
  func.func @transform_7(%arg0: i32, %arg1: i32) -> (i32, i32) {
    %c0_i32 = arith.constant 0 : i32
    %c0_i32_0 = arith.constant 0 : i32
    %c0_i32_1 = arith.constant 0 : i32
    return %c0_i32, %c0_i32_0 : i32, i32
  }
  func.func @transform_8(%arg0: i32, %arg1: i32) -> (i32, i32) {
    %c0_i32 = arith.constant 0 : i32
    %c0_i32_0 = arith.constant 0 : i32
    %c0_i32_1 = arith.constant 0 : i32
    return %c0_i32, %c0_i32_0 : i32, i32
  }
  func.func @transform_9(%arg0: i32, %arg1: i32) -> (i32, i32) {
    %c0_i32 = arith.constant 0 : i32
    %c0_i32_0 = arith.constant 0 : i32
    %c0_i32_1 = arith.constant 0 : i32
    return %c0_i32, %c0_i32_0 : i32, i32
  }
  func.func @transform_10(%arg0: i32, %arg1: i32) -> (i32, i32) {
    %c0_i32 = arith.constant 0 : i32
    %c0_i32_0 = arith.constant 0 : i32
    %c0_i32_1 = arith.constant 0 : i32
    return %c0_i32, %c0_i32_0 : i32, i32
  }
  func.func @transform_11(%arg0: i32, %arg1: i32) -> (i32, i32) {
    %c0_i32 = arith.constant 0 : i32
    %c0_i32_0 = arith.constant 0 : i32
    %c0_i32_1 = arith.constant 0 : i32
    return %c0_i32, %c0_i32_0 : i32, i32
  }
  func.func @transform_12(%arg0: i32, %arg1: i32) -> (i32, i32) {
    %c0_i32 = arith.constant 0 : i32
    %c0_i32_0 = arith.constant 0 : i32
    %c0_i32_1 = arith.constant 0 : i32
    return %c0_i32, %c0_i32_0 : i32, i32
  }
  func.func @transform_13(%arg0: i32, %arg1: i32) -> (i32, i32) {
    %c0_i32 = arith.constant 0 : i32
    %c0_i32_0 = arith.constant 0 : i32
    %c0_i32_1 = arith.constant 0 : i32
    return %c0_i32, %c0_i32_0 : i32, i32
  }
  func.func @transform_14(%arg0: i32, %arg1: i32) -> (i32, i32, i32) {
    %c0_i32 = arith.constant 0 : i32
    %c0_i32_0 = arith.constant 0 : i32
    return %arg0, %arg1, %c0_i32 : i32, i32, i32
  }
}

</mosaic_0001>

<bundles_post_ra>
// kernel: tpu_custom_call.1
= control target key start
LH: loop header
LB: loop body
LE: loop exit
PB: predicated region body
PF: predicated region fallthrough
CT: control target
= control target key end

     0   :  { %s3397_s0 = inlined_call_operand.hbm [shape: bf16[2,16,32], index: 0, kind: input, shape index: {}]   ;;  %s3398_s1 = inlined_call_operand.hbm [shape: bf16[2,8,32], index: 1, kind: input, shape index: {}]   ;;  %s3399_s2 = inlined_call_operand.hbm [shape: bf16[2,8,32], index: 2, kind: input, shape index: {}]   ;;  %s3400_s3 = inlined_call_operand.hbm [shape: bf16[2,8,32], index: 3, kind: input, shape index: {}]   ;;  %s3401_s4 = inlined_call_operand.hbm [shape: bf16[32,32], index: 4, kind: input, shape index: {}]   ;;  %s3402_s5 = inlined_call_operand.vmem [shape: bf16[32,32], index: 5, kind: input, shape index: {}]   ;;  %s3403_s6 = inlined_call_operand.hbm [shape: bf16[32,32], index: 6, kind: input, shape index: {}]   ;;  %s3404_s7 = inlined_call_operand.hbm [shape: bf16[32,64], index: 7, kind: input, shape index: {}]   ;;  %s3405_s8 = inlined_call_operand.hbm [shape: bf16[32,32], index: 8, kind: input, shape index: {}]   ;;  %s3406_s9 = inlined_call_operand.vmem [shape: f32[1,32], index: 9, kind: input, shape index: {}]   ;;  %s3407_s10 = inlined_call_operand.vmem [shape: f32[1,32], index: 10, kind: input, shape index: {}]   ;;  %s3408_s11 = inlined_call_operand.vmem [shape: f32[1,32], index: 11, kind: input, shape index: {}]   ;;  %s3409_s12 = inlined_call_operand.vmem [shape: f32[1,64], index: 12, kind: input, shape index: {}]   ;;  %s3410_s13 = inlined_call_operand.vmem [shape: f32[1,32], index: 13, kind: input, shape index: {}]   ;;  %s3411_s14 = inlined_call_operand.hbm [shape: f32[2,16,32], index: 14, kind: output, shape index: {}]  }
   0x1   :  { %3448 = sst [smem:[#allocation37_spill]] %s3398_s1 }
   0x2   :  { %3449 = sst [smem:[#allocation38_spill]] %s3399_s2 }
   0x3   :  { %3450 = sst [smem:[#allocation39_spill]] %s3400_s3 }
   0x4   :  { %3451 = sst [smem:[#allocation40_spill]] %s3401_s4 }
   0x5   :  { %3452 = sst [smem:[#allocation41_spill]] %s3402_s5 }
   0x6   :  { %3453 = sst [smem:[#allocation42_spill]] %s3403_s6 }
   0x7   :  { %3454 = sst [smem:[#allocation43_spill]] %s3404_s7 }
   0x8   :  { %3455 = sst [smem:[#allocation44_spill]] %s3405_s8 }
   0x9   :  { %3456 = sst [smem:[#allocation45_spill]] %s3406_s9 }
   0xa   :  { %3457 = sst [smem:[#allocation46_spill]] %s3407_s10 }
   0xb   :  { %3458 = sst [smem:[#allocation47_spill]] %s3408_s11 }
   0xc   :  { %3459 = sst [smem:[#allocation48_spill]] %s3409_s12 }
   0xd   :  { %3460 = sst [smem:[#allocation49_spill]] %s3410_s13 }
   0xe   :  { %3461 = sst [smem:[#allocation50_spill]] %s3411_s14 }
   0xf   :  { %19 = vsyncpa [#allocation5], 0 }
  0x10   :  { %21 = vsyncpa [#allocation5 + $0x1], 0 }
  0x11   :  { %22 = vsyncpa [#allocation8], 0 }
  0x12   :  { %24 = vsyncpa [#allocation8 + $0x1], 0 }
  0x13   :  { %25 = vsyncpa [#allocation11], 0 }
  0x14   :  { %27 = vsyncpa [#allocation11 + $0x1], 0 }
  0x15   :  { %28 = vsyncpa [#allocation14], 0 }
  0x16   :  { %29 = vsyncpa [#allocation17], 0 }
  0x17   :  { %30 = vsyncpa [#allocation6], 0 }
  0x18   :  { %32 = vsyncpa [#allocation6 + $0x1], 0  ;;  %s2748_s29 = smov 0   ;;  %s2750_s30 = smov 0  }
  0x19   :  { %s2752_s15 = smov 0   ;;  %s2754_s16 = smov 0  }
  0x1a   :  { %s2756_s17 = smov 0   ;;  %s2758_s18 = smov 0  }
  0x1b   :  { %s2760_s19 = smov 0   ;;  %s2762_s20 = smov 0  }
  0x1c   :  { %s2764_s21 = smov 0   ;;  %s2766_s22 = smov 0  }
  0x1d   :  { %s2768_s23 = smov 0  }
  0x1e LB: > { %3462 = sst [smem:[#allocation26_spill]] %s2616_s30  ;;  %s2804_s24 = sadd.s32 4294967295, %s2652_s23   ;;  %s2652_s23 = sphi %s2768_s23, %s38_s23   ;;  %s2648_s22 = sphi %s2766_s22, %s3544_s22   ;;  %s2644_s21 = sphi %s2764_s21, %s3543_s21   ;;  %s2640_s20 = sphi %s2762_s20, %s3542_s20   ;;  %s2636_s19 = sphi %s2760_s19, %s3541_s19   ;;  %s2632_s18 = sphi %s2758_s18, %s3540_s18   ;;  %s2628_s17 = sphi %s2756_s17, %s3539_s17   ;;  %s2624_s16 = sphi %s2754_s16, %s3538_s16   ;;  %s2620_s15 = sphi %s2752_s15, %s3537_s15   ;;  %s2616_s30 = sphi %s2750_s30, %s3536_s30   ;;  %s2612_s29 = sphi %s2748_s29, %s3533_s29  }
  0x1f   : > { %3463 = sst [smem:[#allocation27_spill]] %s2624_s16  ;;  %p1870_p0 = scmp.ge.s32.totalorder %s2652_s23, 1 }
  0x20   : > { %3464 = sst [smem:[#allocation28_spill]] %s2636_s19  ;;  %p3414_p1 = scmp.eq.s32.totalorder %s2804_s24, 0 }
  0x21   : > { %3465 = sst [smem:[#allocation29_spill]] %s2640_s20  ;;  %p399_p2 = scmp.lt.s32.totalorder %s2652_s23, 5 }
  0x22   : > { %3466 = sst [smem:[#allocation30_spill]] %s2804_s24  ;;  %s2654_s26 = smov [#allocation12]  }
  0x23   : > { %p2809_p3 = pnand %p1870_p0, %p399_p2  ;;  %s411_s27 = sshll.u32 %s2654_s26, 4  ;;  %s412_s27 = int_to_ptr.vmem [resolvable:$true] %s411_s27 }
  0x24   : > { %s2655_s14 = smov [#allocation13]   ;;  %s3470_s4 = sld [smem:[#allocation40_spill]] }
  0x25   : > { %s3467_s25 = scalar_select %p2809_p3, 1, 0 }
  0x26   : > { %p2096_p4 = pneg %p2809_p3  ;;  %s427_s13 = sshll.u32 %s2655_s14, 4  ;;  %s2821_s13 = int_to_ptr.vmem [resolvable:$true] %s427_s13 }
  0x27   : > { %3468 = sst [smem:[#allocation31_spill]] %s3467_s25 }
  0x28   : > { %p2817_p5 = pnand %p2096_p4, %p3414_p1 }
  0x2a   : > { %s3469_s28 = scalar_select %p2817_p5, 1, 0 }
  0x2b   : > { %s2278_s12 = scalar_lea.hbm %s3470_s4, 256  ;;  %p2831_p7 = pneg %p2817_p5 }
  0x2c   : > { %p2279_p6 = scmp.ne.s32.totalorder %s3470_s4, %s2278_s12  ;;  %p2285_p10 = scmp.lt.u32.totalorder %s2278_s12, %s3470_s4 }
  0x2d   : > { %s3471_s26 = scalar_select %p2831_p7, 1, 0 }
  0x2e   : > { %p2281_p8 = pnand %p2831_p7, %p2279_p6 }
  0x30   : > { %p2282_p9 = pneg %p2281_p8 }
  0x32   : > { %p2287_p11 = pnand %p2285_p10, %p2282_p9 }
  0x34   : > { %2290 = shalt.err (!%p2287_p11)
}
  0x35   : > { %s2291_s9 = scalar_lea.vmem %s412_s27, 256  ;;  %p2299_p2 = scmp.lt.s32.totalorder %s412_s27, %s412_s27 }
  0x36   : > { %p2292_p12 = scmp.ne.s32.totalorder %s412_s27, %s2291_s9  ;;  %p2300_p4 = scmp.lt.s32.totalorder %s2291_s9, %s2291_s9 }
  0x38   : > { %p2294_p13 = pnand %p2292_p12, %p2831_p7  ;;  %p2301_p1 = por %p2300_p4, %p2299_p2 }
  0x3a   : > { %p2295_p0 = pneg %p2294_p13 }
  0x3c   : > { %p2302_p3 = pnand %p2301_p1, %p2295_p0 }
  0x3e   : > { %2305 = shalt.err (!%p2302_p3)
}
  0x3f   : > { %s3419_s10 = smov 64   ;;  %s3421_s11 = smov 4  }
  0x40   : > { %2099 = dma.hbm_to_vmem [thread:$0]  (!%p2817_p5), %s3470_s4, 256, %s412_s27, [#allocation11], %s3419_s10, %s3419_s10, %s3421_s11  }
  0x41   : > { %s3472_s6 = sld [smem:[#allocation42_spill]] }
  0x47   : > { %s2306_s19 = scalar_lea.hbm %s3472_s6, 256 }
  0x48   : > { %p2307_p1 = scmp.ne.s32.totalorder %s3472_s6, %s2306_s19  ;;  %p2313_p8 = scmp.lt.u32.totalorder %s2306_s19, %s3472_s6 }
  0x4a   : > { %p2309_p3 = pnand %p2307_p1, %p2831_p7 }
  0x4c   : > { %p2310_p6 = pneg %p2309_p3 }
  0x4e   : > { %p2315_p9 = pnand %p2313_p8, %p2310_p6 }
  0x50   : > { %2318 = shalt.err (!%p2315_p9)
}
  0x51   : > { %s2319_s27 = scalar_lea.vmem %s2821_s13, 256  ;;  %p2327_p13 = scmp.lt.s32.totalorder %s2821_s13, %s2821_s13 }
  0x52   : > { %p2320_p10 = scmp.ne.s32.totalorder %s2821_s13, %s2319_s27  ;;  %p2328_p0 = scmp.lt.s32.totalorder %s2319_s27, %s2319_s27 }
  0x54   : > { %p2322_p11 = pnand %p2320_p10, %p2831_p7  ;;  %p2329_p2 = por %p2328_p0, %p2327_p13 }
  0x56   : > { %p2323_p12 = pneg %p2322_p11 }
  0x58   : > { %p2330_p4 = pnand %p2329_p2, %p2323_p12 }
  0x5a   : > { %2333 = shalt.err (!%p2330_p4)
}
  0x5b   : > { %2102 = dma.hbm_to_vmem [thread:$0]  (!%p2817_p5), %s3472_s6, 256, %s2821_s13, [#allocation14], %s3419_s10, %s3419_s10, %s3421_s11  }
  0x5c   : > { %p3424_p1 = scmp.eq.s32.totalorder %s2652_s23, 0  ;;  %p92_p3 = scmp.ne.s32.totalorder %s2620_s15, %s2616_s30 }
  0x5d   : > { %p98_p6 = scmp.ne.s32.totalorder %s2616_s30, %s2612_s29  ;;  %p3423_p8 = scmp.lt.s32.totalorder %s2652_s23, 4 }
  0x5e   : > { %s3425_s25 = sand.u32 1, %s2652_s23   ;;  %p94_p9 = por %p92_p3, %p3424_p1 }
  0x5f   : > { %p3473_p10 = scmp.eq.s32.totalorder %s2804_s24, 0  ;;  %s504_s12 = sand.u32 1, %s2620_s15  }
  0x60   : > { %s2893_s20 = sshll.u32 %s504_s12, 2  ;;  %s2896_s14 = sshll.u32 %s2648_s22, 6 }
  0x61   : > { %p2888_p11 = por %p98_p6, %p3473_p10  ;;  %s3476_s1 = sld [smem:[#allocation37_spill]] }
  0x62   : > { %s506_s27 = scalar_lea.vmem [#allocation7], %s2893_s20  ;;  %p2907_p12 = pnand %p3423_p8, %p94_p9 }
  0x63   : > { %s3474_s5 = scalar_select %p2888_p11, 1, 0 }
  0x64   : > { %s513_s2 = sshll.u32 %s506_s27, 4  ;;  %s2915_s12 = scalar_lea.sflag [#allocation8], %s3425_s25  ;;  %s2911_s2 = int_to_ptr.vmem [resolvable:$true] %s513_s2 }
  0x65   : > { %3475 = sst [smem:[#allocation32_spill]] %s3474_s5  ;;  %p2921_p0 = pneg %p2907_p12 }
  0x66   : > { %s3477_s3 = scalar_select %p2907_p12, 1, 0 }
  0x67   : > { %s2902_s29 = scalar_lea.hbm %s3476_s1, %s2896_s14  ;;  %s2339_s10 = scalar_lea.hbm %s3476_s1, 128 }
  0x68   : > { %s2334_s13 = scalar_lea.hbm %s2902_s29, 64  ;;  %p2340_p3 = scmp.lt.u32.totalorder %s2902_s29, %s3476_s1 }
  0x69   : > { %p2335_p13 = scmp.ne.s32.totalorder %s2902_s29, %s2334_s13  ;;  %p2341_p6 = scmp.lt.u32.totalorder %s2339_s10, %s2334_s13 }
  0x6a   : > { %s3478_s9 = scalar_select %p2921_p0, 1, 0 }
  0x6b   : > { %p2337_p2 = pnand %p2921_p0, %p2335_p13  ;;  %p2342_p9 = por %p2341_p6, %p2340_p3 }
  0x6c   : > { %p2343_p10 = scmp.lt.u32.totalorder %s2334_s13, %s2902_s29 }
  0x6d   : > { %p2338_p4 = pneg %p2337_p2 }
  0x6e   : > { %p2344_p8 = por %p2343_p10, %p2342_p9 }
  0x70   : > { %p2345_p1 = pnand %p2344_p8, %p2338_p4 }
  0x72   : > { %2348 = shalt.err (!%p2345_p1)
}
  0x73   : > { %s2349_s25 = scalar_lea.vmem %s2911_s2, 64  ;;  %s2658_s19 = smov [#allocation7]  }
  0x74   : > { %p2350_p13 = scmp.ne.s32.totalorder %s2911_s2, %s2349_s25  ;;  %s2354_s27 = sshll.u32 %s2658_s19, 4  ;;  %s2355_s27 = int_to_ptr.vmem [resolvable:$false] %s2354_s27 }
  0x75   : > { %s2356_s4 = scalar_lea.vmem %s2355_s27, 128  ;;  %p2357_p5 = scmp.lt.s32.totalorder %s2911_s2, %s2355_s27 }
  0x76   : > { %p2352_p2 = pnand %p2350_p13, %p2921_p0  ;;  %p2358_p7 = scmp.lt.s32.totalorder %s2356_s4, %s2349_s25 }
  0x78   : > { %p2353_p11 = pneg %p2352_p2  ;;  %p2359_p3 = por %p2358_p7, %p2357_p5 }
  0x7a   : > { %p2360_p6 = pnand %p2359_p3, %p2353_p11 }
  0x7c   : > { %2363 = shalt.err (!%p2360_p6)
}
  0x7d   : > { %2115 = dma.hbm_to_vmem [thread:$0]  (!%p2907_p12), %s2902_s29, 64, %s2911_s2, %s2915_s12  }
  0x7e   : > { %s2659_s10 = smov [#allocation15]   ;;  %s2660_s13 = smov [#allocation16]  }
  0x7f   : > { %s440_s11 = sshll.u32 %s2659_s10, 4  ;;  %s453_s1 = sshll.u32 %s2660_s13, 4  ;;  %s441_s11 = int_to_ptr.vmem [resolvable:$true] %s440_s11  ;;  %s454_s1 = int_to_ptr.vmem [resolvable:$true] %s453_s1 }
  0x80   : > { %s3479_s7 = sld [smem:[#allocation43_spill]]  ;;  %p3480_p7 = scmp.ne.s32.totalorder %s3471_s26, 0 }
  0x86   : > { %s2364_s27 = scalar_lea.hbm %s3479_s7, 256 }
  0x87   : > { %p2365_p5 = scmp.ne.s32.totalorder %s3479_s7, %s2364_s27  ;;  %p2371_p11 = scmp.lt.u32.totalorder %s2364_s27, %s3479_s7 }
  0x89   : > { %p2367_p1 = pnand %p2365_p5, %p3480_p7 }
  0x8b   : > { %p2368_p8 = pneg %p2367_p1 }
  0x8d   : > { %p2373_p4 = pnand %p2371_p11, %p2368_p8 }
  0x8f   : > { %2376 = shalt.err (!%p2373_p4)
}
  0x90   : > { %s2377_s29 = scalar_lea.vmem %s441_s11, 256  ;;  %p2385_p2 = scmp.lt.s32.totalorder %s441_s11, %s441_s11 }
  0x91   : > { %p2378_p9 = scmp.ne.s32.totalorder %s441_s11, %s2377_s29  ;;  %p2386_p3 = scmp.lt.s32.totalorder %s2377_s29, %s2377_s29 }
  0x93   : > { %p2380_p10 = pnand %p2378_p9, %p3480_p7  ;;  %p2387_p6 = por %p2386_p3, %p2385_p2 }
  0x95   : > { %p2381_p13 = pneg %p2380_p10 }
  0x97   : > { %p2388_p12 = pnand %p2387_p6, %p2381_p13 }
  0x99   : > { %2391 = shalt.err (!%p2388_p12)
}
  0x9a   : > { %p3481_p5 = scmp.ne.s32.totalorder %s3469_s28, 0  ;;  %s3482_s6 = smov 4  }
  0x9b   : > { %s3483_s2 = smov 64   ;;  %s3484_s8 = sld [smem:[#allocation44_spill]] }
  0x9c   : > { %2105 = dma.hbm_to_vmem [thread:$0]  (!%p3481_p5), %s3479_s7, 256, %s441_s11, [#allocation14], %s3483_s2, %s3483_s2, %s3482_s6  }
  0xa1   : > { %s2392_s19 = scalar_lea.hbm %s3484_s8, 256 }
  0xa2   : > { %p2393_p1 = scmp.ne.s32.totalorder %s3484_s8, %s2392_s19  ;;  %p2399_p11 = scmp.lt.u32.totalorder %s2392_s19, %s3484_s8 }
  0xa4   : > { %p2395_p12 = pnand %p2393_p1, %p3480_p7 }
  0xa6   : > { %p2396_p8 = pneg %p2395_p12 }
  0xa8   : > { %p2401_p4 = pnand %p2399_p11, %p2396_p8 }
  0xaa   : > { %2404 = shalt.err (!%p2401_p4)
}
  0xab   : > { %s2405_s30 = scalar_lea.vmem %s454_s1, 256  ;;  %p2413_p2 = scmp.lt.s32.totalorder %s454_s1, %s454_s1 }
  0xac   : > { %p2406_p9 = scmp.ne.s32.totalorder %s454_s1, %s2405_s30  ;;  %p2414_p3 = scmp.lt.s32.totalorder %s2405_s30, %s2405_s30 }
  0xae   : > { %p2408_p10 = pnand %p2406_p9, %p3480_p7  ;;  %p2415_p6 = por %p2414_p3, %p2413_p2 }
  0xb0   : > { %p2409_p13 = pneg %p2408_p10 }
  0xb2   : > { %p2416_p0 = pnand %p2415_p6, %p2409_p13 }
  0xb4   : > { %2419 = shalt.err (!%p2416_p0)
}
  0xb5   : > { %2108 = dma.hbm_to_vmem [thread:$0]  (!%p3481_p5), %s3484_s8, 256, %s454_s1, [#allocation17], %s3483_s2, %s3483_s2, %s3482_s6  }
  0xb6   : > { %s1869_s28 = sadd.s32 4294967294, %s2652_s23   ;;  %s47_s26 = sadd.s32 1, %s2644_s21 }
  0xb7   : > { %s50_s10 = sadd.s32 1, %s2648_s22  ;;  %p48_p0 = scmp.ge.s32.totalorder %s47_s26, 2 }
  0xb8   : > { %s59_s13 = sadd.s32 1, %s2632_s18  ;;  %p66_p7 = scmp.ne.s32.totalorder %s2632_s18, %s2628_s17 }
  0xb9   : > { %p72_p1 = scmp.ne.s32.totalorder %s2628_s17, %s2624_s16  ;;  %s3546_s26 = smov (%p48_p0, %s47_s26), 0 }
  0xba   : > { %3485 = sst [smem:[#allocation33_spill]] %s3546_s26  ;;  %s3548_s10 = smov (!%p48_p0, %s50_s10), %s2648_s22 }
  0xbb   : > { %s55_s19 = ssub.s32 %s2644_s21, %s3546_s26  ;;  %p3486_p12 = scmp.eq.s32.totalorder %s2652_s23, 0 }
  0xbc   : > { %p52_p5 = scmp.ge.s32.totalorder %s3548_s10, 2  ;;  %p3488_p11 = scmp.eq.s32.totalorder %s2804_s24, 0 }
  0xbd   : > { %p3002_p8 = por %p3486_p12, %p66_p7  ;;  %p386_p9 = scmp.eq.s32.totalorder %s2804_s24, 3 }
  0xbe   : > { %p3008_p4 = por %p3488_p11, %p72_p1  ;;  %p392_p10 = scmp.eq.s32.totalorder %s1869_s28, 3 }
  0xbf   : > { %s3550_s10 = smov (%p52_p5, %s3548_s10), 0  ;;  %p3015_p13 = por %p386_p9, %p66_p7 }
  0xc0   : > { %s3489_s6 = scalar_select %p3008_p4, 1, 0 }
  0xc1   : > { %3490 = sst [smem:[#allocation34_spill]] %s3550_s10  ;;  %p3019_p2 = por %p392_p10, %p72_p1 }
  0xc2   : > { %s3491_s2 = scalar_select %p3015_p13, 1, 0 }
  0xc3   : > { %s3493_s27 = scalar_select %p3019_p2, 1, 0 }
  0xc4   : > { %3492 = sst [smem:[#allocation35_spill]] %s3491_s2  ;;  %s54_s25 = ssub.s32 %s2648_s22, %s3550_s10 }
  0xc5   : > { %3494 = sst [smem:[#allocation36_spill]] %s3493_s27  ;;  %s482_s4 = sand.u32 1, %s2632_s18  }
  0xc6   : > { %s56_s29 = sor.u32 %s55_s19, %s54_s25  ;;  %p83_p3 = scmp.eq.s32.totalorder %s54_s25, 0 }
  0xc7   : > { %p57_p6 = scmp.eq.s32.totalorder %s56_s29, 0  ;;  %s3495_s30 = sadd.s32 1, %s2620_s15 }
  0xc8   : > { %s3029_s11 = scalar_select %p83_p3, %s2620_s15, %s3495_s30  }
  0xc9   : > { %s3032_s5 = scalar_select %p57_p6, %s2632_s18, %s59_s13  }
  0xca   : > { %s1876_s28 = sshll.u32 %s482_s4, 2  ;;  %s1877_s7 = sshll.u32 %s2648_s22, 1 }
  0xcb   : > { %s491_s8 = sadd.s32 %s2644_s21, %s1877_s7  ;;  %s486_s16 = scalar_lea.vmem [#allocation4], %s1876_s28 }
  0xcc   : > { %s1878_s26 = sshll.u32 %s491_s8, 6  ;;  %s495_s27 = sshll.u32 %s486_s16, 4  ;;  %s3041_s27 = int_to_ptr.vmem [resolvable:$true] %s495_s27 }
  0xcd   : > { %s3039_s10 = scalar_lea.hbm %s3397_s0, %s1878_s26  ;;  %p3496_p0 = scmp.lt.s32.totalorder %s2652_s23, 4 }
  0xce   : > { %s3498_s16 = sld [smem:[#allocation38_spill]]  ;;  %s524_s26 = scalar_lea.vmem [#allocation9], %s2893_s20 }
  0xcf   : > { %p3047_p7 = pnand %p3496_p0, %p3002_p8  ;;  %s531_s19 = sshll.u32 %s524_s26, 4  ;;  %s3058_s19 = int_to_ptr.vmem [resolvable:$true] %s531_s19 }
  0xd0   : > { %s483_s2 = scalar_lea.sflag [#allocation5], %s482_s4  ;;  %s2420_s29 = scalar_lea.hbm %s3039_s10, 64 }
  0xd1   : > { %p2421_p1 = scmp.ne.s32.totalorder %s3039_s10, %s2420_s29  ;;  %p2422_p12 = pneg %p3047_p7 }
  0xd2   : > { %s2425_s28 = scalar_lea.hbm %s3397_s0, 256  ;;  %p2426_p11 = scmp.lt.u32.totalorder %s3039_s10, %s3397_s0 }
  0xd3   : > { %p2423_p8 = pnand %p2422_p12, %p2421_p1  ;;  %p2427_p9 = scmp.lt.u32.totalorder %s2425_s28, %s2420_s29 }
  0xd4   : > { %s3499_s25 = smov %s3498_s16  ;;  %s3055_s24 = scalar_lea.hbm %s3498_s16, %s2896_s14 }
  0xd5   : > { %p2424_p5 = pneg %p2423_p8  ;;  %p2428_p10 = por %p2427_p9, %p2426_p11 }
  0xd6   : > { %p2429_p3 = scmp.lt.u32.totalorder %s2420_s29, %s3039_s10 }
  0xd8   : > { %p2430_p6 = por %p2429_p3, %p2428_p10 }
  0xda   : > { %p2431_p0 = pnand %p2430_p6, %p2424_p5 }
  0xdc   : > { %2434 = shalt.err (!%p2431_p0)
}
  0xdd   : > { %s2435_s4 = scalar_lea.vmem %s3041_s27, 64  ;;  %s2661_s16 = smov [#allocation4]  }
  0xde   : > { %p2436_p1 = scmp.ne.s32.totalorder %s3041_s27, %s2435_s4  ;;  %s2440_s26 = sshll.u32 %s2661_s16, 4  ;;  %s2441_s26 = int_to_ptr.vmem [resolvable:$false] %s2440_s26 }
  0xdf   : > { %s2442_s1 = scalar_lea.vmem %s2441_s26, 128  ;;  %p2443_p13 = scmp.lt.s32.totalorder %s3041_s27, %s2441_s26 }
  0xe0   : > { %p2438_p8 = pnand %p2436_p1, %p2422_p12  ;;  %p2444_p11 = scmp.lt.s32.totalorder %s2442_s1, %s2435_s4 }
  0xe2   : > { %p2439_p2 = pneg %p2438_p8  ;;  %p2445_p9 = por %p2444_p11, %p2443_p13 }
  0xe4   : > { %p2446_p10 = pnand %p2445_p9, %p2439_p2 }
  0xe6   : > { %2449 = shalt.err (!%p2446_p10)
}
  0xe7   : > { %2112 = dma.hbm_to_vmem [thread:$0]  (!%p3047_p7), %s3039_s10, 64, %s3041_s27, %s483_s2  }
  0xe8   : > { %s2450_s29 = scalar_lea.hbm %s3055_s24, 64  ;;  %p3500_p5 = scmp.ne.s32.totalorder %s3478_s9, 0 }
  0xe9   : > { %p2451_p12 = scmp.ne.s32.totalorder %s3055_s24, %s2450_s29  ;;  %s2455_s7 = scalar_lea.hbm %s3499_s25, 128 }
  0xea   : > { %p2456_p13 = scmp.lt.u32.totalorder %s3055_s24, %s3499_s25  ;;  %p2457_p2 = scmp.lt.u32.totalorder %s2455_s7, %s2450_s29 }
  0xeb   : > { %p2453_p3 = pnand %p2451_p12, %p3500_p5  ;;  %p2459_p1 = scmp.lt.u32.totalorder %s2450_s29, %s3055_s24 }
  0xec   : > { %p2458_p0 = por %p2457_p2, %p2456_p13 }
  0xed   : > { %p2454_p6 = pneg %p2453_p3 }
  0xee   : > { %p2460_p8 = por %p2459_p1, %p2458_p0 }
  0xf0   : > { %p2461_p11 = pnand %p2460_p8, %p2454_p6 }
  0xf2   : > { %2464 = shalt.err (!%p2461_p11)
}
  0xf3   : > { %s2465_s10 = scalar_lea.vmem %s3058_s19, 64  ;;  %s2662_s27 = smov [#allocation9]  }
  0xf4   : > { %p2466_p7 = scmp.ne.s32.totalorder %s3058_s19, %s2465_s10  ;;  %s2470_s13 = sshll.u32 %s2662_s27, 4  ;;  %s2471_s13 = int_to_ptr.vmem [resolvable:$false] %s2470_s13 }
  0xf5   : > { %s2472_s2 = scalar_lea.vmem %s2471_s13, 128  ;;  %p2473_p12 = scmp.lt.s32.totalorder %s3058_s19, %s2471_s13 }
  0xf6   : > { %p2468_p9 = pnand %p2466_p7, %p3500_p5  ;;  %p2474_p3 = scmp.lt.s32.totalorder %s2472_s2, %s2465_s10 }
  0xf8   : > { %p2469_p10 = pneg %p2468_p9  ;;  %p2475_p13 = por %p2474_p3, %p2473_p12 }
  0xfa   : > { %p2476_p2 = pnand %p2475_p13, %p2469_p10 }
  0xfc   : > { %2479 = shalt.err (!%p2476_p2)
}
  0xfd   : > { %p3501_p6 = scmp.ne.s32.totalorder %s3477_s3, 0  ;;  %s3502_s1 = sld [smem:[#allocation39_spill]] }
  0xfe   : > { %s542_s30 = scalar_lea.vmem [#allocation10], %s2893_s20  ;;  %s3503_s7 = sand.u32 1, %s2652_s23  }
  0xff   : > { %2118 = dma.hbm_to_vmem [thread:$0]  (!%p3501_p6), %s3055_s24, 64, %s3058_s19, %s2915_s12  }
 0x100   : > { %s549_s28 = sshll.u32 %s542_s30, 4  ;;  %s539_s8 = scalar_lea.sflag [#allocation11], %s3503_s7  ;;  %s550_s28 = int_to_ptr.vmem [resolvable:$true] %s549_s28 }
 0x103   : > { %s3111_s29 = scalar_lea.hbm %s3502_s1, %s2896_s14  ;;  %s2485_s19 = scalar_lea.hbm %s3502_s1, 128 }
 0x104   : > { %s2480_s4 = scalar_lea.hbm %s3111_s29, 64  ;;  %p2486_p11 = scmp.lt.u32.totalorder %s3111_s29, %s3502_s1 }
 0x105   : > { %p2481_p0 = scmp.ne.s32.totalorder %s3111_s29, %s2480_s4  ;;  %p2487_p7 = scmp.lt.u32.totalorder %s2485_s19, %s2480_s4 }
 0x106   : > { %p2489_p10 = scmp.lt.u32.totalorder %s2480_s4, %s3111_s29 }
 0x107   : > { %p2483_p1 = pnand %p2481_p0, %p3500_p5  ;;  %p2488_p9 = por %p2487_p7, %p2486_p11 }
 0x109   : > { %p2484_p8 = pneg %p2483_p1  ;;  %p2490_p12 = por %p2489_p10, %p2488_p9 }
 0x10b   : > { %p2491_p3 = pnand %p2490_p12, %p2484_p8 }
 0x10d   : > { %2494 = shalt.err (!%p2491_p3)
}
 0x10e   : > { %s2495_s20 = scalar_lea.vmem %s550_s28, 64  ;;  %s2663_s27 = smov [#allocation10]  }
 0x10f   : > { %p2496_p13 = scmp.ne.s32.totalorder %s550_s28, %s2495_s20  ;;  %s2500_s13 = sshll.u32 %s2663_s27, 4  ;;  %s2501_s13 = int_to_ptr.vmem [resolvable:$false] %s2500_s13 }
 0x110   : > { %s2502_s2 = scalar_lea.vmem %s2501_s13, 128  ;;  %p2503_p1 = scmp.lt.s32.totalorder %s550_s28, %s2501_s13 }
 0x111   : > { %p2498_p2 = pnand %p2496_p13, %p3500_p5  ;;  %p2504_p4 = scmp.lt.s32.totalorder %s2502_s2, %s2495_s20 }
 0x113   : > { %p2499_p0 = pneg %p2498_p2  ;;  %p2505_p6 = por %p2504_p4, %p2503_p1 }
 0x115   : > { %p2506_p7 = pnand %p2505_p6, %p2499_p0 }
 0x117   : > { %2509 = shalt.err (!%p2506_p7)
}
 0x118   : > { %p3504_p11 = scmp.ne.s32.totalorder %s3477_s3, 0  ;;  %s3505_s16 = sld [smem:[#allocation31_spill]] }
 0x11a   : > { %2121 = dma.hbm_to_vmem [thread:$0]  (!%p3504_p11), %s3111_s29, 64, %s550_s28, %s539_s8  }
 0x11e   : > { %p3506_p8 = scmp.ne.s32.totalorder %s3505_s16, 0 }
 0x11f   : > { %s3136_s9 = sand.u32 (!%p3506_p8), 1, %s2628_s17   ;;  %p3507_p4 = scmp.ne.s32.totalorder (!%p3506_p8), %s3489_s6, 0 }
 0x120   : > { %558 = sbr.rel (%p3506_p8) target bundleno = 3634 (0xe32), region = 76  ;;  %s1886_s26 = sshll.u32 (!%p3506_p8), %s3136_s9, 2 }
 0x121   : > { %s561_s30 = scalar_lea.sflag (!%p3506_p8), [#allocation5], %s3136_s9  ;;  %s3140_s7 = scalar_lea.vmem (!%p3506_p8), [#allocation4], %s1886_s26 }
 0x127   : > { %2583 = dma.done.wait (%p3507_p4), %s561_s30, 64  }
 0x128   : > { %2585 = vsyncadd (%p3507_p4), %s561_s30, 4294967232  ;;  %s3508_s3 = sld [smem:[#allocation30_spill]]  ;;  %s3509_s29 = sld [smem:[#allocation26_spill]] }
 0x129   : > { %s3510_s28 = sld [smem:[#allocation32_spill]] }
 0x12e   : > { %s569_s8 = sand.u32 1, %s3508_s3   ;;  %s571_s4 = sand.u32 1, %s3509_s29  }
 0x12f   : > { %s3148_s12 = sshll.u32 %s571_s4, 2  ;;  %s570_s24 = scalar_lea.sflag [#allocation8], %s569_s8 }
 0x130   : > { %s573_s19 = scalar_lea.vmem [#allocation7], %s3148_s12  ;;  %p3511_p5 = scmp.ne.s32.totalorder %s3510_s28, 0 }
 0x132   : > { %2587 = dma.done.wait (%p3511_p5), %s570_s24, 128  }
 0x133   : > { %2589 = vsyncadd (%p3511_p5), %s570_s24, 4294967168  ;;  %s582_s6 = scalar_lea.vmem [#allocation9], %s3148_s12  ;;  %s588_s14 = scalar_lea.sflag [#allocation11], %s569_s8 }
 0x134   : > { %s591_s10 = scalar_lea.vmem [#allocation10], %s3148_s12 }
 0x135   : > { %2591 = dma.done.wait (%p3511_p5), %s588_s14, 64  }
 0x136   : > { %2593 = vsyncadd (%p3511_p5), %s588_s14, 4294967232  ;;  %p3512_p6 = scmp.eq.s32.totalorder %s3508_s3, 0 }
 0x138   : > { %2595 = dma.done.wait (%p3512_p6), [#allocation11], 256   ;;  %p3513_p9 = pmov %p3512_p6 }
 0x139   : > { %p3514_p10 = pmov %p3512_p6 }
 0x13a   : > { %2597 = vsyncadd (%p3513_p9), [#allocation11], 4294967040 }
 0x13b   : > { %2599 = dma.done.wait (%p3514_p10), [#allocation14], 512   ;;  %p3515_p12 = pmov %p3512_p6 }
 0x13c   : > { %p3516_p3 = pmov %p3512_p6 }
 0x13d   : > { %2601 = vsyncadd (%p3515_p12), [#allocation14], 4294966784 }
 0x13e   : > { %2603 = dma.done.wait (%p3516_p3), [#allocation17], 256   ;;  %p3517_p13 = pmov %p3516_p3 }
 0x13f   : > { %s1894_s20 = sshll.u32 %s3136_s9, 3  ;;  %s3518_s13 = sld [smem:[#allocation28_spill]] }
 0x140   : > { %2605 = vsyncadd (%p3517_p13), [#allocation17], 4294967040  ;;  %s3174_s27 = scalar_lea.vmem [#allocation18], %s1894_s20 }
 0x145   : > { %p1895_p2 = scmp.ne.s32.totalorder %s3518_s13, 0 }
 0x146   : > { %s3519_s26 = sld [smem:[#allocation41_spill]] (!%p1895_p2)  ;;  %v2664_v1 = vmov (!%p1895_p2), 0.0   ;;  %vm2665_vm0 = vmmov (!%p1895_p2), 0   ;;  %v2242_v3 = vld [vmem:[#allocation13] sm:$0xff] (!%p1895_p2)   ;;  %v672_v4 = vld [vmem:[%s573_s19] sm:$0xf] (!%p1895_p2) }
 0x147   : > { %671 = sbr.rel (%p1895_p2) target bundleno = 682 (0x2aa), region = 112  ;;  %1966 = vmatprep.subr.bf16.mxu0 (!%p1895_p2), %v2664_v1  ;;  %1974 = vmatprep.subr.bf16.mxu1 (!%p1895_p2), %v2664_v1  ;;  %vm696_vm1 = vcmask (!%p1895_p2), 261120   ;;  %v2240_v5 = vld [vmem:[#allocation15] sm:$0xff] (!%p1895_p2)   ;;  %v2243_v6 = vld [vmem:[#allocation13 + $0x8] sm:$0xff] (!%p1895_p2)   ;;  %v2241_v7 = vld [vmem:[#allocation15 + $0x8] sm:$0xff] (!%p1895_p2)   ;;  %s3520_s8 = sld [smem:[#allocation46_spill]] (!%p1895_p2) }
 0x148   : > { %1970 = vmatprep.mubr.msk.bf16.mxu0 (!%p1895_p2), %vm2665_vm0, %v2664_v1  ;;  %1978 = vmatprep.mubr.msk.bf16.mxu1 (!%p1895_p2), %vm2665_vm0, %v2664_v1  ;;  %v740_v8 = vld [vmem:[%s582_s6] sm:$0xf] (!%p1895_p2)  ;;  %v807_v9 = vld [vmem:[%s591_s10] sm:$0xf] (!%p1895_p2)  ;;  %vm875_vm2 = vcmask (!%p1895_p2), 257024   ;;  %s3521_s19 = sld [smem:[#allocation47_spill]] (!%p1895_p2) }
 0x149   : > { %1975 = vmatpush3.bf16.msra.mxu1 (!%p1895_p2), %v2242_v3  ;;  %s3522_s14 = sld [smem:[#allocation48_spill]] (!%p1895_p2)  ;;  %vm883_vm3 = vcmask (!%p1895_p2), 261124   ;;  %s2666_s10 = smov (!%p1895_p2), 96  }
 0x14a   : > { %1976 = vmatprep.subr.bf16.mxu1 (!%p1895_p2), %v2664_v1 }
 0x14c   : > { %v2238_v0 = vld [vmem:[%s3519_s26] sm:$0xff] (!%p1895_p2)   ;;  %v2239_v2 = vld [vmem:[%s3519_s26 + $0x8] sm:$0xff] (!%p1895_p2)  }
 0x14d   : > { %1967 = vmatpush3.bf16.msra.mxu0 (!%p1895_p2), %v2238_v0  ;;  %1977 = vmatpush3.bf16.msra.mxu1 (!%p1895_p2), %v2243_v6  ;;  %v1896_v10 = vld [vmem:[%s3520_s8] ss:$0 sm:$0xff] (!%p1895_p2) }
 0x14e   : > { %1968 = vmatprep.subr.bf16.mxu0 %v2664_v1  ;;  %v1900_v17 = vld [vmem:[%s3521_s19] ss:$0 sm:$0xff] }
 0x14f   : > { %v1904_v19 = vld [vmem:[%s3522_s14] ss:$0 sm:$0xff] }
 0x150   : > { %1979 = vmatmul.mubr.msk.bf16.vlgmr.msra.gmra.mrb[0].mxu1 %vm696_vm1, %v740_v8 }
 0x151   : > { %1969 = vmatpush3.bf16.msra.mxu0 %v2239_v2 }
 0x152   : > { %1982 = vmatprep.subr.bf16.mxu0 %v2664_v1 }
 0x154   : > { %1971 = vmatmul.mubr.msk.bf16.vlgmr.msra.gmra.mrb[0].mxu0 %vm696_vm1, %v672_v4 }
 0x155   : > { %1983 = vmatpush3.bf16.msra.mxu0 %v2240_v5  ;;  %1986 = vmatprep.mubr.msk.bf16.mxu0 %vm2665_vm0, %v2664_v1 }
 0x156   : > { %1984 = vmatprep.subr.bf16.mxu0 %v2664_v1 }
 0x159   : > { %1985 = vmatpush3.bf16.msra.mxu0 %v2241_v7 }
 0x15c   : > { %1987 = vmatmul.mubr.msk.bf16.vlgmr.msra.gmra.mrb[4].mxu0 %vm696_vm1, %v807_v9 }
 0x223   : > { %v801_v18 = vpop.f32.mrb[0].mxu1 }
 0x224   : > { %v802_v20 = vadd.f32 %v1900_v17, %v801_v18  ;;  %v1980_v21 = vpop.f32.mrb[1].mxu1 }
 0x225   : > { %v804_v22 = vpop.f32.mrb[2].mxu1 }
 0x226   : > { %v877_v24 = vpack.c.bf16 %v802_v20, %v802_v20  ;;  %v1981_v25 = vpop.f32.mrb[3].mxu1 }
 0x227   : > { %v734_v11 = vpop.f32.mrb[0].mxu0 }
 0x228   : > { %v735_v12 = vadd.f32 %v1896_v10, %v734_v11  ;;  %v1972_v13 = vpop.f32.mrb[1].mxu0  ;;  %878 = vst.msk [vmem:[#allocation3] sm:$0xf] %vm875_vm2, %v877_v24 }
 0x229   : > { %v737_v14 = vpop.f32.mrb[2].mxu0 }
 0x22a   : > { %v874_v15 = vpack.c.bf16 %v735_v12, %v735_v12  ;;  %v1973_v16 = vpop.f32.mrb[3].mxu0 }
 0x22c   : > { %876 = vst.msk [vmem:[#allocation2] sm:$0xf] %vm875_vm2, %v874_v15 }
 0x22f   : > { %v868_v23 = vpop.f32.mrb[4].mxu0 }
 0x230   : > { %v869_v26 = vadd.f32 %v1904_v19, %v868_v23  ;;  %v1988_v27 = vpop.f32.mrb[5].mxu0 }
 0x231   : > { %v871_v28 = vpop.f32.mrb[6].mxu0 }
 0x232   : > { %v879_v29 = vpack.c.bf16 %v869_v26, %v869_v26  ;;  %v1989_v30 = vpop.f32.mrb[7].mxu0 }
 0x234   : > { %v881_v31 = vrot.slane %v879_v29, 4 }
 0x236   : > { %885 = vrot.lane.b32.xlu0 %v881_v31, %s2666_s10  ;;  %884 = vst.msk [vmem:[#allocation2] sm:$0xf0] %vm883_vm3, %v881_v31 }
 0x2a8   : > { %v886_v32 = vpop.permute.xlu0 %885 }
 0x2a9   : > { %888 = vst.msk [vmem:[#allocation3] sm:$0xf0] %vm883_vm3, %v886_v32 }
 0x2aa PF: > { %v2244_v33 = vld [vmem:[#allocation12] sm:$0xff]   ;;  %v2667_v34 = vmov 0.0   ;;  %v2245_v35 = vld [vmem:[#allocation12 + $0x8] sm:$0xff]   ;;  %vm2668_vm4 = vmmov 0   ;;  %v3208_v36 = vld [vmem:[#allocation2] sm:$0xff]  ;;  %vm964_vm5 = vcmask 64512  }
 0x2ab   : > { %1990 = vmatprep.subr.bf16.mxu0 %v2667_v34  ;;  %1998 = vmatprep.subr.bf16.mxu1 %v2667_v34  ;;  %s2669_s20 = smov 120   ;;  %v969_v37 = vsel %vm964_vm5, %v3208_v36, 0  ;;  %v889_v38 = vld [vmem:[%s3140_s7] sm:$0xf]  ;;  %vm913_vm6 = vcmask 261120   ;;  %s3523_s16 = sld [smem:[#allocation45_spill]] }
 0x2ac   : > { %1991 = vmatpush3.bf16.msra.mxu0 %v2244_v33  ;;  %1994 = vmatprep.mubr.msk.bf16.mxu0 %vm2668_vm4, %v2667_v34  ;;  %vm1018_vm7 = vcmask 130112   ;;  %s2670_s7 = smov 112   ;;  %vm1041_vm8 = vcmask 130048   ;;  %vm1218_vm9 = vcmask 1043456   ;;  %s2671_s30 = smov 104  }
 0x2ad   : > { %1992 = vmatprep.subr.bf16.mxu0 %v2667_v34  ;;  %1090 = vrot.lane.b32.xlu0 %v3208_v36, %s2669_s20  ;;  %s3524_s29 = sld [smem:[#allocation29_spill]]  ;;  %s3525_s3 = sld [smem:[#allocation28_spill]] }
 0x2ae   : > { %1999 = vmatpush3.bf16.xpose.msra.mxu1 %v969_v37  ;;  %2000 = vmatprep.mubr.msk.bf16.mxu1 %vm2668_vm4, %v2667_v34  ;;  %s3526_s4 = sld [smem:[#allocation35_spill]]  ;;  %s3527_s12 = sld [smem:[#allocation49_spill]] }
 0x2af   : > { %2010 = vmatprep.subr.bf16.mxu1 %v2667_v34  ;;  %s1679_s14 = sshll.u32 %s3174_s27, 4  ;;  %s3528_s13 = sld [smem:[#allocation50_spill]]  ;;  %s3334_s14 = int_to_ptr.vmem [resolvable:$true] %s1679_s14 }
 0x2b0   : > { %1993 = vmatpush3.bf16.msra.mxu0 %v2245_v35  ;;  %v3244_v7 = vld [vmem:[#allocation3] sm:$0xff] }
 0x2b1   : > { %2004 = vmatprep.subr.bf16.mxu0 %v2667_v34  ;;  %v1908_v39 = vld [vmem:[%s3523_s16] ss:$0 sm:$0xff]  ;;  %s1664_s16 = scalar_lea.sflag [#allocation6], %s3136_s9 }
 0x2b3   : > { %1995 = vmatmul.mubr.msk.bf16.vlgmr.msra.gmra.mrb[0].mxu0 %vm913_vm6, %v889_v38  ;;  %s1926_s28 = sshll.u32 %s3524_s29, 1 }
 0x2b4   : > { %2006 = vmatprep.mubr.msk.bf16.mxu0 %vm2668_vm4, %v2667_v34  ;;  %2005 = vmatpush3.bf16.msra.mxu0 %v3244_v7  ;;  %s1675_s8 = sadd.s32 %s3525_s3, %s1926_s28  ;;  %p3529_p1 = scmp.ne.s32.totalorder %s3526_s4, 0 }
 0x2b5   : > { %2016 = vmatprep.subr.bf16.mxu0 %v2667_v34  ;;  %s1927_s6 = sshll.u32 %s1675_s8, 7 }
 0x2b6   : > { %s3332_s2 = scalar_lea.hbm %s3528_s13, %s1927_s6 }
 0x31f   : > { %v1091_v41 = vpop.permute.xlu0 %1090 }
 0x320   : > { %v1096_v47 = vsel %vm964_vm5, %v1091_v41, 0  ;;  %v960_v41 = vld [vmem:[#allocation16] sm:$0xf] }
 0x386   : > { %v951_v40 = vpop.f32.mrb[0].mxu0 }
 0x387   : > { %v952_v42 = vadd.f32 %v1908_v39, %v951_v40  ;;  %v1996_v43 = vpop.f32.mrb[1].mxu0 }
 0x388   : > { %v954_v44 = vpop.f32.mrb[2].mxu0  ;;  %v961_v43 = vld [vmem:[#allocation16 + $0x4] sm:$0xf] }
 0x389   : > { %v3226_v45 = vpack.c.bf16 %v952_v42, %v952_v42  ;;  %v1997_v46 = vpop.f32.mrb[3].mxu0  ;;  %v1266_v42 = vsel %vm1218_vm9, %v960_v41, 0  ;;  %v1220_v44 = vsel %vm1218_vm9, %v961_v43, 0 }
 0x38b   : > { %1087 = vrot.lane.b32.xlu0 %v3226_v45, %s2669_s20  ;;  %2001 = vmatmul.mubr.msk.bf16.vlgmr.msra.gmra.mrb[0].mxu1 %vm964_vm5, %v3226_v45 }
 0x38c   : > { %2011 = vmatpush3.bf16.xpose.msra.mxu1 %v1096_v47  ;;  %2012 = vmatprep.mubr.msk.bf16.mxu1 %vm2668_vm4, %v2667_v34 }
 0x38d   : > { %2022 = vmatprep.subr.bf16.mxu1 %v2667_v34 }
 0x3fd   : > { %v1088_v48 = vpop.permute.xlu0 %1087 }
 0x3fe   : > { %2013 = vmatmul.mubr.msk.bf16.vlgmr.msra.gmra.mrb[4].mxu1 %vm964_vm5, %v1088_v48 }
 0x3ff   : > { %2024 = vmatprep.mubr.msk.bf16.mxu1 %vm2668_vm4, %v2667_v34  ;;  %2023 = vmatpush3.bf16.msra.mxu1 %v1220_v44 }
 0x400   : > { %2034 = vmatprep.subr.bf16.mxu1 %v2667_v34 }
 0x45e   : > { %v1005_v49 = vpop.f32.mrb[0].mxu1 }
 0x45f   : > { %v1011_v50 = vmul.f32 0.35355338, %v1005_v49  ;;  %v2002_v51 = vpop.f32.mrb[1].mxu1 }
 0x460   : > { %v1008_v52 = vpop.f32.mrb[2].mxu1 }
 0x461   : > { %v2003_v53 = vpop.f32.mrb[3].mxu1  ;;  %v1019_v54 = vsel %vm1018_vm7, %v1011_v50, -inf  ;;  %v1012_v55 = vsel %vm964_vm5, %v1011_v50, -inf }
 0x462   : > { %1020 = vmax.xlane.f32.xlu1 %v1019_v54  ;;  %1013 = vmax.xlane.f32.xlu0 %v1012_v55 }
 0x4d1   : > { %v1132_v56 = vpop.f32.mrb[4].mxu1 }
 0x4d2   : > { %v1138_v57 = vmul.f32 0.35355338, %v1132_v56  ;;  %v2014_v58 = vpop.f32.mrb[5].mxu1 }
 0x4d3   : > { %v1135_v59 = vpop.f32.mrb[6].mxu1 }
 0x4d4   : > { %v2015_v60 = vpop.f32.mrb[7].mxu1  ;;  %v1145_v61 = vsel %vm1018_vm7, %v1138_v57, -inf  ;;  %v1139_v62 = vsel %vm964_vm5, %v1138_v57, -inf }
 0x4d5   : > { %1146 = vmax.xlane.f32.xlu1 %v1145_v61 }
 0x4d9   : > { %1140 = vmax.xlane.f32.xlu1 %v1139_v62 }
 0x4ef   : > { %v1021_v63 = vpop.xlane.xlu1 %1020  ;;  %v1014_v15 = vpop.xlane.xlu0 %1013 }
 0x4f0   : > { %v1022_v0 = vsub.f32 %v1011_v50, %v1021_v63  ;;  %v1015_v16 = vsub.f32 %v1011_v50, %v1014_v15 }
 0x4f2   : > { %v1023_v1 = vmul.f32 1.442695, %v1022_v0  ;;  %v1016_v17 = vmul.f32 1.442695, %v1015_v16 }
 0x4f4   : > { %2246 = vpow2.f32 %v1023_v1 }
 0x4fe   : > { %v2247_v2 = vpop.eup %2246 }
 0x4ff   : > { %1031 = vrot.lane.b32.xlu1 %v2247_v2, %s2669_s20 }
 0x562   : > { %v1147_v3 = vpop.xlane.xlu1 %1146 }
 0x563   : > { %v1148_v4 = vsub.f32 %v1138_v57, %v1147_v3 }
 0x565   : > { %v1149_v5 = vmul.f32 1.442695, %v1148_v4 }
 0x566   : > { %v1141_v6 = vpop.xlane.xlu1 %1140 }
 0x567   : > { %2248 = vpow2.f32 %v1149_v5  ;;  %v1142_v8 = vsub.f32 %v1138_v57, %v1141_v6 }
 0x569   : > { %v1143_v9 = vmul.f32 1.442695, %v1142_v8 }
 0x56b   : > { %2250 = vpow2.f32 %v1143_v9 }
 0x56c   : > { %2252 = vpow2.f32 %v1016_v17 }
 0x571   : > { %v2249_v10 = vpop.eup %2248  ;;  %v1032_v11 = vpop.permute.xlu1 %1031 }
 0x572   : > { %1157 = vrot.lane.b32.xlu1 %v2249_v10, %s2669_s20  ;;  %v1034_v12 = vsel %vm964_vm5, %v1032_v11, 0.0 }
 0x573   : > { %1035 = vadd.xlane.f32.xlu0 %v1034_v12 }
 0x575   : > { %v2251_v13 = vpop.eup %2250 }
 0x576   : > { %v1151_v14 = vsel %vm964_vm5, %v2251_v13, 0.0  ;;  %v2253_v18 = vpop.eup %2252 }
 0x577   : > { %1152 = vadd.xlane.f32.xlu0 %v1151_v14  ;;  %v1025_v19 = vsel %vm964_vm5, %v2253_v18, 0.0 }
 0x596   : > { %1026 = vadd.xlane.f32.xlu1 %v1025_v19 }
 0x5a7   : > { %1310 = vrot.lane.b32.xlu1 %v3208_v36, %s2670_s7 }
 0x5e4   : > { %v1158_v20 = vpop.permute.xlu1 %1157 }
 0x5e5   : > { %v1160_v21 = vsel %vm964_vm5, %v1158_v20, 0.0 }
 0x5e6   : > { %1161 = vadd.xlane.f32.xlu0 %v1160_v21 }
 0x5fc   : > { %1168 = vrot.lane.b32.xlu0 %v3244_v7, %s2669_s20 }
 0x600   : > { %1308 = vrot.lane.b32.xlu0 %v3226_v45, %s2670_s7  ;;  %v1036_v22 = vpop.xlane.xlu0 %1035 }
 0x601   : > { %2254 = vrcp.f32 %v1036_v22 }
 0x604   : > { %v1153_v30 = vpop.xlane.xlu0 %1152 }
 0x60b   : > { %v2255_v24 = vpop.eup %2254 }
 0x60c   : > { %v1038_v26 = vmul.f32 %v2255_v24, %v2247_v2 }
 0x623   : > { %v1027_v23 = vpop.xlane.xlu1 %1026 }
 0x624   : > { %2256 = vrcp.f32 %v1027_v23 }
 0x625   : > { %2258 = vrcp.f32 %v1153_v30 }
 0x627   : > { %v1311_v51 = vpop.permute.xlu1 %1310 }
 0x628   : > { %v1316_v54 = vsel %vm964_vm5, %v1311_v51, 0 }
 0x62e   : > { %v2257_v25 = vpop.eup %2256 }
 0x62f   : > { %v1029_v27 = vmul.f32 %v2257_v25, %v2253_v18  ;;  %v2259_v33 = vpop.eup %2258 }
 0x630   : > { %v1155_v37 = vmul.f32 %v2259_v33, %v2251_v13  ;;  %v962_v33 = vld [vmem:[#allocation16 + $0x8] sm:$0xf] }
 0x631   : > { %v1039_v28 = vsel %vm964_vm5, %v1029_v27, %v1038_v26 }
 0x632   : > { %v1040_v29 = vpack.c.bf16 %v1039_v28, %v1039_v28 }
 0x634   : > { %2007 = vmatmul.mubr.msk.bf16.vlgmr.msra.gmra.mrb[4].mxu0 %vm1041_vm8, %v1040_v29 }
 0x635   : > { %2018 = vmatprep.mubr.msk.bf16.mxu0 %vm2668_vm4, %v2667_v34 }
 0x673   : > { %v1162_v31 = vpop.xlane.xlu0 %1161 }
 0x674   : > { %2260 = vrcp.f32 %v1162_v31 }
 0x677   : > { %v1169_v32 = vpop.permute.xlu0 %1168 }
 0x678   : > { %2017 = vmatpush3.bf16.msra.mxu0 %v1169_v32 }
 0x679   : > { %2028 = vmatprep.subr.bf16.mxu0 %v2667_v34 }
 0x67b   : > { %v1309_v58 = vpop.permute.xlu0 %1308 }
 0x67e   : > { %v2261_v35 = vpop.eup %2260 }
 0x67f   : > { %v1164_v38 = vmul.f32 %v2261_v35, %v2249_v10  ;;  %v1438_v35 = vsel %vm1218_vm9, %v962_v33, 0 }
 0x681   : > { %v1165_v39 = vsel %vm964_vm5, %v1155_v37, %v1164_v38 }
 0x682   : > { %v1166_v40 = vpack.c.bf16 %v1165_v39, %v1165_v39 }
 0x684   : > { %2019 = vmatmul.mubr.msk.bf16.vlgmr.msra.gmra.mrb[8].mxu0 %vm1041_vm8, %v1166_v40 }
 0x685   : > { %2030 = vmatprep.mubr.msk.bf16.mxu0 %vm2668_vm4, %v2667_v34  ;;  %2029 = vmatpush3.bf16.msra.mxu0 %v1266_v42 }
 0x686   : > { %2040 = vmatprep.subr.bf16.mxu0 %v2667_v34 }
 0x707   : > { %v1079_v46 = vpop.f32.mrb[4].mxu0 }
 0x708   : > { %v1085_v47 = vpack.c.bf16 %v1079_v46, %v1079_v46  ;;  %v2008_v48 = vpop.f32.mrb[5].mxu0 }
 0x709   : > { %v1082_v49 = vpop.f32.mrb[6].mxu0 }
 0x70a   : > { %v2009_v50 = vpop.f32.mrb[7].mxu0  ;;  %2031 = vmatmul.mubr.msk.bf16.vlgmr.msra.gmra.mrb[12].mxu0 %vm964_vm5, %v1085_v47 }
 0x70b   : > { %2042 = vmatprep.mubr.msk.bf16.mxu0 %vm2668_vm4, %v2667_v34 }
 0x757   : > { %v1208_v52 = vpop.f32.mrb[8].mxu0 }
 0x758   : > { %v1214_v53 = vpack.c.bf16 %v1208_v52, %v1208_v52  ;;  %v2020_v55 = vpop.f32.mrb[9].mxu0 }
 0x759   : > { %v1211_v56 = vpop.f32.mrb[10].mxu0 }
 0x75a   : > { %v2021_v57 = vpop.f32.mrb[11].mxu0  ;;  %2025 = vmatmul.mubr.msk.bf16.vlgmr.msra.gmra.mrb[8].mxu1 %vm964_vm5, %v1214_v53 }
 0x75b   : > { %2035 = vmatpush3.bf16.xpose.msra.mxu1 %v1316_v54  ;;  %2036 = vmatprep.mubr.msk.bf16.mxu1 %vm2668_vm4, %v2667_v34 }
 0x75c   : > { %2046 = vmatprep.subr.bf16.mxu1 %v2667_v34 }
 0x762   : > { %2037 = vmatmul.mubr.msk.bf16.vlgmr.msra.gmra.mrb[12].mxu1 %vm964_vm5, %v1309_v58 }
 0x763   : > { %2048 = vmatprep.mubr.msk.bf16.mxu1 %vm2668_vm4, %v2667_v34  ;;  %2047 = vmatpush3.bf16.msra.mxu1 %v1438_v35 }
 0x764   : > { %2058 = vmatprep.subr.bf16.mxu1 %v2667_v34 }
 0x7dd   : > { %v1302_v59 = vpop.f32.mrb[12].mxu0 }
 0x7de   : > { %v2032_v60 = vpop.f32.mrb[13].mxu0 }
 0x7df   : > { %v1305_v61 = vpop.f32.mrb[14].mxu0 }
 0x7e0   : > { %v2033_v62 = vpop.f32.mrb[15].mxu0 }
 0x82d   : > { %v1256_v63 = vpop.f32.mrb[8].mxu1 }
 0x82e   : > { %v3283_v0 = vadd.f32 %v1302_v59, %v1256_v63  ;;  %v2026_v1 = vpop.f32.mrb[9].mxu1 }
 0x82f   : > { %v1259_v2 = vpop.f32.mrb[10].mxu1 }
 0x830   : > { %v2027_v3 = vpop.f32.mrb[11].mxu1 }
 0x831   : > { %v963_v3 = vld [vmem:[#allocation16 + $0xc] sm:$0xf] }
 0x835   : > { %v1352_v4 = vpop.f32.mrb[12].mxu1 }
 0x836   : > { %v1358_v5 = vmul.f32 0.35355338, %v1352_v4  ;;  %v2038_v6 = vpop.f32.mrb[13].mxu1  ;;  %v1611_v4 = vsel %vm1218_vm9, %v963_v3, 0 }
 0x837   : > { %v1355_v8 = vpop.f32.mrb[14].mxu1 }
 0x838   : > { %v2039_v9 = vpop.f32.mrb[15].mxu1  ;;  %v1365_v10 = vsel %vm1018_vm7, %v1358_v5, -inf  ;;  %v1359_v11 = vsel %vm964_vm5, %v1358_v5, -inf }
 0x839   : > { %1366 = vmax.xlane.f32.xlu0 %v1365_v10  ;;  %1360 = vmax.xlane.f32.xlu1 %v1359_v11 }
 0x8c6   : > { %v1367_v12 = vpop.xlane.xlu0 %1366  ;;  %v1361_v13 = vpop.xlane.xlu1 %1360 }
 0x8c7   : > { %v1368_v14 = vsub.f32 %v1358_v5, %v1367_v12  ;;  %v1362_v15 = vsub.f32 %v1358_v5, %v1361_v13 }
 0x8c9   : > { %v1369_v16 = vmul.f32 1.442695, %v1368_v14  ;;  %v1363_v17 = vmul.f32 1.442695, %v1362_v15 }
 0x8cb   : > { %2262 = vpow2.f32 %v1369_v16 }
 0x8cc   : > { %2264 = vpow2.f32 %v1363_v17 }
 0x8d5   : > { %v2263_v18 = vpop.eup %2262 }
 0x8d6   : > { %v2265_v19 = vpop.eup %2264  ;;  %1377 = vrot.lane.b32.xlu0 %v2263_v18, %s2669_s20 }
 0x8d7   : > { %v1371_v20 = vsel %vm964_vm5, %v2265_v19, 0.0 }
 0x8d8   : > { %1372 = vadd.xlane.f32.xlu1 %v1371_v20 }
 0x8da   : > { %1387 = vrot.lane.b32.xlu0 %v3244_v7, %s2670_s7  ;;  %s2510_s7 = scalar_lea.vmem %s3334_s14, 128 }
 0x8db   : > { %p2511_p0 = scmp.ne.s32.totalorder %s3334_s14, %s2510_s7 }
 0x8dd   : > { %p2512_p7 = pnand %p2511_p0, %p3529_p1 }
 0x8de   : > { %1481 = vrot.lane.b32.xlu0 %v3226_v45, %s2671_s30 }
 0x8df   : > { %p2513_p11 = pneg %p2512_p7 }
 0x948   : > { %v1378_v21 = vpop.permute.xlu0 %1377 }
 0x949   : > { %v1380_v22 = vsel %vm964_vm5, %v1378_v21, 0.0 }
 0x94a   : > { %1381 = vadd.xlane.f32.xlu1 %v1380_v22 }
 0x94c   : > { %v1388_v23 = vpop.permute.xlu0 %1387 }
 0x94d   : > { %2041 = vmatpush3.bf16.msra.mxu0 %v1388_v23 }
 0x94e   : > { %2052 = vmatprep.subr.bf16.mxu0 %v2667_v34 }
 0x95b   : > { %1483 = vrot.lane.b32.xlu1 %v3208_v36, %s2671_s30  ;;  %v1482_v36 = vpop.permute.xlu0 %1481 }
 0x965   : > { %v1373_v24 = vpop.xlane.xlu1 %1372 }
 0x966   : > { %2266 = vrcp.f32 %v1373_v24 }
 0x970   : > { %v2267_v26 = vpop.eup %2266 }
 0x971   : > { %v1375_v28 = vmul.f32 %v2267_v26, %v2265_v19 }
 0x9d7   : > { %v1382_v25 = vpop.xlane.xlu1 %1381 }
 0x9d8   : > { %2268 = vrcp.f32 %v1382_v25 }
 0x9db   : > { %v1484_v45 = vpop.permute.xlu1 %1483 }
 0x9dc   : > { %v1489_v31 = vsel %vm964_vm5, %v1484_v45, 0 }
 0x9e2   : > { %v2269_v27 = vpop.eup %2268 }
 0x9e3   : > { %v1384_v29 = vmul.f32 %v2269_v27, %v2263_v18  ;;  %v1924_v18 = vld [vmem:[%s3527_s12] ss:$0 sm:$0xff] }
 0x9e5   : > { %v1385_v30 = vsel %vm964_vm5, %v1375_v28, %v1384_v29 }
 0x9e6   : > { %v1386_v32 = vpack.c.bf16 %v1385_v30, %v1385_v30 }
 0x9e8   : > { %2043 = vmatmul.mubr.msk.bf16.vlgmr.msra.gmra.mrb[16].mxu0 %vm1041_vm8, %v1386_v32 }
 0x9e9   : > { %2053 = vmatpush3.bf16.xpose.msra.mxu0 %v1489_v31  ;;  %2054 = vmatprep.mubr.msk.bf16.mxu0 %vm2668_vm4, %v2667_v34 }
 0x9ea   : > { %2064 = vmatprep.subr.bf16.mxu0 %v2667_v34 }
 0x9f0   : > { %2055 = vmatmul.mubr.msk.bf16.vlgmr.msra.gmra.mrb[20].mxu0 %vm964_vm5, %v1482_v36 }
 0x9f1   : > { %2066 = vmatprep.mubr.msk.bf16.mxu0 %vm2668_vm4, %v2667_v34  ;;  %2065 = vmatpush3.bf16.msra.mxu0 %v1611_v4 }
 0xabb   : > { %v1427_v37 = vpop.f32.mrb[16].mxu0 }
 0xabc   : > { %v1433_v38 = vpack.c.bf16 %v1427_v37, %v1427_v37  ;;  %v2044_v39 = vpop.f32.mrb[17].mxu0 }
 0xabd   : > { %v1430_v40 = vpop.f32.mrb[18].mxu0 }
 0xabe   : > { %v2045_v41 = vpop.f32.mrb[19].mxu0  ;;  %2049 = vmatmul.mubr.msk.bf16.vlgmr.msra.gmra.mrb[16].mxu1 %vm964_vm5, %v1433_v38 }
 0xabf   : > { %2060 = vmatprep.mubr.msk.bf16.mxu1 %vm2668_vm4, %v2667_v34 }
 0xac3   : > { %v1525_v42 = vpop.f32.mrb[20].mxu0 }
 0xac4   : > { %v1531_v43 = vmul.f32 0.35355338, %v1525_v42  ;;  %v2056_v44 = vpop.f32.mrb[21].mxu0 }
 0xac5   : > { %v1528_v46 = vpop.f32.mrb[22].mxu0 }
 0xac6   : > { %v2057_v47 = vpop.f32.mrb[23].mxu0  ;;  %v1538_v48 = vsel %vm1018_vm7, %v1531_v43, -inf  ;;  %v1532_v49 = vsel %vm964_vm5, %v1531_v43, -inf }
 0xac7   : > { %1539 = vmax.xlane.f32.xlu0 %v1538_v48  ;;  %1533 = vmax.xlane.f32.xlu1 %v1532_v49 }
 0xb54   : > { %v1540_v50 = vpop.xlane.xlu0 %1539  ;;  %v1534_v51 = vpop.xlane.xlu1 %1533 }
 0xb55   : > { %v1541_v52 = vsub.f32 %v1531_v43, %v1540_v50  ;;  %v1535_v53 = vsub.f32 %v1531_v43, %v1534_v51 }
 0xb57   : > { %v1542_v54 = vmul.f32 1.442695, %v1541_v52  ;;  %v1536_v55 = vmul.f32 1.442695, %v1535_v53 }
 0xb59   : > { %2270 = vpow2.f32 %v1542_v54 }
 0xb5a   : > { %2272 = vpow2.f32 %v1536_v55 }
 0xb63   : > { %v2271_v34 = vpop.eup %2270 }
 0xb64   : > { %v2273_v56 = vpop.eup %2272  ;;  %1550 = vrot.lane.b32.xlu0 %v2271_v34, %s2669_s20 }
 0xb65   : > { %v1544_v57 = vsel %vm964_vm5, %v2273_v56, 0.0 }
 0xb66   : > { %1545 = vadd.xlane.f32.xlu1 %v1544_v57 }
 0xb68   : > { %1560 = vrot.lane.b32.xlu0 %v3244_v7, %s2671_s30  ;;  %s2672_s30 = smov [#allocation18]  }
 0xb69   : > { %s2514_s29 = sshll.u32 %s2672_s30, 4  ;;  %s2515_s29 = int_to_ptr.vmem [resolvable:$false] %s2514_s29 }
 0xb6a   : > { %s2516_s3 = scalar_lea.vmem %s2515_s29, 256  ;;  %p2517_p8 = scmp.lt.s32.totalorder %s3334_s14, %s2515_s29 }
 0xb6b   : > { %p2518_p4 = scmp.lt.s32.totalorder %s2516_s3, %s2510_s7 }
 0xb6d   : > { %p2519_p5 = por %p2518_p4, %p2517_p8 }
 0xb6f   : > { %p2520_p6 = pnand %p2519_p5, %p2513_p11 }
 0xb91   : > { %v1474_v58 = vpop.f32.mrb[16].mxu1 }
 0xb92   : > { %v1480_v59 = vadd.f32 %v1474_v58, %v3283_v0  ;;  %v2050_v60 = vpop.f32.mrb[17].mxu1 }
 0xb93   : > { %v1477_v61 = vpop.f32.mrb[18].mxu1 }
 0xb94   : > { %v2051_v62 = vpop.f32.mrb[19].mxu1 }
 0xbd6   : > { %v1551_v63 = vpop.permute.xlu0 %1550 }
 0xbd7   : > { %v1553_v1 = vsel %vm964_vm5, %v1551_v63, 0.0 }
 0xbd8   : > { %1554 = vadd.xlane.f32.xlu1 %v1553_v1 }
 0xbda   : > { %v1561_v2 = vpop.permute.xlu0 %1560 }
 0xbdb   : > { %2059 = vmatpush3.bf16.msra.mxu1 %v1561_v2 }
 0xbf3   : > { %v1546_v5 = vpop.xlane.xlu1 %1545 }
 0xbf4   : > { %2274 = vrcp.f32 %v1546_v5 }
 0xbfe   : > { %v2275_v0 = vpop.eup %2274 }
 0xbff   : > { %v1548_v8 = vmul.f32 %v2275_v0, %v2273_v56 }
 0xc65   : > { %v1555_v7 = vpop.xlane.xlu1 %1554 }
 0xc66   : > { %2276 = vrcp.f32 %v1555_v7 }
 0xc70   : > { %v2277_v6 = vpop.eup %2276 }
 0xc71   : > { %v1557_v9 = vmul.f32 %v2277_v6, %v2271_v34 }
 0xc73   : > { %v1558_v10 = vsel %vm964_vm5, %v1548_v8, %v1557_v9 }
 0xc74   : > { %v1559_v11 = vpack.c.bf16 %v1558_v10, %v1558_v10 }
 0xc76   : > { %2061 = vmatmul.mubr.msk.bf16.vlgmr.msra.gmra.mrb[20].mxu1 %vm1041_vm8, %v1559_v11 }
 0xd49   : > { %v1600_v12 = vpop.f32.mrb[20].mxu1 }
 0xd4a   : > { %v1606_v13 = vpack.c.bf16 %v1600_v12, %v1600_v12  ;;  %v2062_v14 = vpop.f32.mrb[21].mxu1 }
 0xd4b   : > { %v1603_v15 = vpop.f32.mrb[22].mxu1 }
 0xd4c   : > { %v2063_v16 = vpop.f32.mrb[23].mxu1  ;;  %2067 = vmatmul.mubr.msk.bf16.vlgmr.msra.gmra.mrb[24].mxu0 %vm964_vm5, %v1606_v13 }
 0xe1f   : > { %v1647_v17 = vpop.f32.mrb[24].mxu0 }
 0xe20   : > { %v1653_v19 = vadd.f32 %v1647_v17, %v1480_v59  ;;  %v2068_v20 = vpop.f32.mrb[25].mxu0 }
 0xe21   : > { %v1650_v21 = vpop.f32.mrb[26].mxu0 }
 0xe22   : > { %v1661_v22 = vadd.f32 %v1924_v18, %v1653_v19  ;;  %v2069_v23 = vpop.f32.mrb[27].mxu0 }
 0xe24   : > { %1662 = vst.msk [vmem:[%s3174_s27] sm:$0xff] %vm913_vm6, %v1661_v22 }
 0xe25   : > { %2523 = shalt.err (!%p2520_p6)
}
 0xe26   : > { %s2524_s9 = scalar_lea.hbm %s3332_s2, 128  ;;  %s2528_s8 = scalar_lea.hbm %s3528_s13, 512 }
 0xe27   : > { %p2525_p9 = scmp.ne.s32.totalorder %s3332_s2, %s2524_s9  ;;  %p2529_p3 = scmp.lt.u32.totalorder %s3332_s2, %s3528_s13 }
 0xe28   : > { %p2530_p13 = scmp.lt.u32.totalorder %s2528_s8, %s2524_s9  ;;  %p2532_p0 = scmp.lt.u32.totalorder %s2524_s9, %s3332_s2 }
 0xe29   : > { %p2526_p10 = pnand %p2525_p9, %p3529_p1 }
 0xe2a   : > { %p2531_p2 = por %p2530_p13, %p2529_p3 }
 0xe2b   : > { %p2527_p12 = pneg %p2526_p10 }
 0xe2c   : > { %p2533_p7 = por %p2532_p0, %p2531_p2 }
 0xe2e   : > { %p2534_p11 = pnand %p2533_p7, %p2527_p12 }
 0xe30   : > { %2537 = shalt.err (!%p2534_p11)
}
 0xe31   : > { %2094 = dma.vmem_to_hbm [thread:$0]  (%p3529_p1), %s3334_s14, 128, %s3332_s2, %s1664_s16  }
 0xe32 PF: > { %s3530_s12 = sld [smem:[#allocation27_spill]]  ;;  %s3531_s6 = sld [smem:[#allocation36_spill]] }
 0xe33   : > { %p2135_p8 = scmp.ge.s32.totalorder %s2652_s23, 2 }
 0xe38   : > { %s1691_s10 = sand.u32 1, %s3530_s12   ;;  %p3532_p4 = scmp.ne.s32.totalorder %s3531_s6, 0 }
 0xe39   : > { %s1692_s20 = scalar_lea.sflag [#allocation6], %s1691_s10 }
 0xe3a   : > { %p2123_p5 = pnand %p2135_p8, %p3532_p4 }
 0xe3c   : > { %2607 = dma.done.wait (!%p2123_p5), %s1692_s20, 128  }
 0xe3d   : > { %2609 = vsyncadd (!%p2123_p5), %s1692_s20, 4294967168  ;;  %s38_s23 = sadd.s32 1, %s2652_s23   ;;  %s3533_s29 = sld [smem:[#allocation26_spill]] }
 0xe3e   : > { %p35_p6 = scmp.ge.s32.totalorder %s38_s23, 6   ;;  %s3534_s4 = sld [smem:[#allocation33_spill]] }
 0xe3f   : > { %s3535_s14 = sld [smem:[#allocation34_spill]]  ;;  %s3536_s30 = smov %s2620_s15 }
 0xe40   : > { %s3537_s15 = smov %s3029_s11  ;;  %s3538_s16 = smov %s2628_s17 }
 0xe41   : > { %s3539_s17 = smov %s2632_s18  ;;  %s3540_s18 = smov %s3032_s5 }
 0xe42   : > { %s3541_s19 = smov %s2644_s21  ;;  %s3542_s20 = smov %s2648_s22 }
 0xe43   :  { %37 = sbr.rel (!%p35_p6) target bundleno = 30 (0x1e), region = 178 }
 0xe44   : > { %s3543_s21 = smov %s3534_s4 }
 0xe45   : > { %s3544_s22 = smov %s3535_s14 }
 0xe4a   :  { %1697 = vsyncpa [#allocation5], 1 }
 0xe4b   :  { %1699 = vsyncpa [#allocation5 + $0x1], 1 }
 0xe4c   :  { %1700 = vsyncpa [#allocation8], 1 }
 0xe4d   :  { %1702 = vsyncpa [#allocation8 + $0x1], 1 }
 0xe4e   :  { %1703 = vsyncpa [#allocation11], 1 }
 0xe4f   :  { %1705 = vsyncpa [#allocation11 + $0x1], 1 }
 0xe50   :  { %1706 = vsyncpa [#allocation14], 1 }
 0xe51   :  { %1707 = vsyncpa [#allocation17], 1 }
 0xe52   :  { %1708 = vsyncpa [#allocation6], 1 }
 0xe53   :  { %1710 = vsyncpa [#allocation6 + $0x1], 1 }

</bundles_post_ra>
